<compile_context>
chip_gen: v5e
topology: v5e:2x2
jax: 0.10.0
libtpu: 0.0.40
codegen_flags: <defaults>
</compile_context>

<pallas_src>
import functools

import numpy as np
import jax
import jax.numpy as jnp
from jax import lax
from jax.experimental import pallas as pl
from jax.experimental.pallas import tpu as pltpu

# ---------------------------------------------------------------------------
# constants ("parameters" of this data pipeline, deterministic)
# ---------------------------------------------------------------------------
# HHblits residue-type order -> AlphaFold residue-type order (correct_msa_restypes)
MAP_HHBLITS_AATYPE_TO_OUR_AATYPE = jnp.array(
    [0, 4, 3, 6, 13, 7, 8, 9, 11, 10, 12, 2, 14, 5, 1, 15, 16, 19, 17, 18, 20, 21],
    dtype=jnp.int32)

GAP_AGREEMENT_WEIGHT = 0.0   # AlphaFold default in nearest_neighbor_clusters
NUM_CH = 23                  # msa one-hot channels (20 aa + X + gap + mask token)
HH_CH = 22                   # hhblits profile channels
MSA_FEAT_CH = 49             # 23 + 1 + 1 + 23 + 1
LANE = 128


def _round_up(x, m):
    return ((x + m - 1) // m) * m


def _vmem_limit_bytes():
    """Scoped-VMEM limit derived from chip capacity (v5e/v6e 128MiB, v7x 64MiB)."""
    try:
        cap = int(pltpu.get_tpu_info().vmem_capacity_bytes)
    except Exception:
        cap = 64 * 1024 * 1024
    return int(min((cap * 3) // 4, 96 * 1024 * 1024))


# ---------------------------------------------------------------------------
# small helper: whole-array VMEM-resident pallas_call (tiny one-shot kernels)
# ---------------------------------------------------------------------------
def _vmem_call(kernel, out_shape, *args):
    return pl.pallas_call(
        kernel,
        out_shape=out_shape,
        in_specs=[pl.BlockSpec(memory_space=pltpu.MemorySpace.VMEM) for _ in args],
        out_specs=pl.BlockSpec(memory_space=pltpu.MemorySpace.VMEM),
    )(*args)


# ---------------------------------------------------------------------------
# Kernel 1: make_hhblits_profile  ->  mean over MSA rows of one_hot(msa, 22)
# Gridded reduction over MSA-row tiles; per-channel row accumulated straight
# into the resident output ref (no [M,R,22] one-hot, no 22-piece concatenate).
# Output is channel-major [22, Rp]; transposed/sliced in the wrapper.
# ---------------------------------------------------------------------------
def _hhblits_profile_kernel(msa_ref, prof_ref, *, inv_m):
    t = pl.program_id(0)

    @pl.when(t == 0)
    def _():
        prof_ref[...] = jnp.zeros_like(prof_ref)

    msa = msa_ref[...]                                        # [TM, Rp] int32 (pad = -1)
    for c in range(HH_CH):
        row = jnp.sum((msa == c).astype(jnp.float32), axis=0, keepdims=True)  # [1, Rp]
        prof_ref[pl.ds(c, 1), :] = prof_ref[pl.ds(c, 1), :] + row

    @pl.when(t == pl.num_programs(0) - 1)
    def _():
        prof_ref[...] = prof_ref[...] * inv_m


def hhblits_profile(msa_p, n_msa_true, *, tile_m=256, vmem_limit=None):
    m, rp = msa_p.shape
    tile_m = min(tile_m, _round_up(m, 8))
    mp = _round_up(m, tile_m)
    if mp != m:
        msa_p = jnp.pad(msa_p, ((0, mp - m), (0, 0)), constant_values=-1)
    nt = mp // tile_m
    kernel = functools.partial(_hhblits_profile_kernel, inv_m=1.0 / float(n_msa_true))
    prof_cm = pl.pallas_call(
        kernel,
        out_shape=jax.ShapeDtypeStruct((HH_CH, rp), jnp.float32),
        grid_spec=pltpu.PrefetchScalarGridSpec(
            num_scalar_prefetch=0,
            grid=(nt,),
            in_specs=[pl.BlockSpec((tile_m, rp), lambda t: (t, 0))],
            out_specs=pl.BlockSpec((HH_CH, rp), lambda t: (0, 0))),
        compiler_params=pltpu.CompilerParams(
            dimension_semantics=("arbitrary",),
            vmem_limit_bytes=vmem_limit),
    )(msa_p)
    return prof_cm.T                                          # [Rp, 22]


# ---------------------------------------------------------------------------
# Kernel 2 (fused): nearest_neighbor_clusters + summarize_clusters
#
# grid = (E ensemble ["parallel"], extra-MSA tiles ["arbitrary"]).
# Per extra-row tile:
#   * agreement[n, t]: ONE batched bf16 MXU contraction over residues with the
#     21 weighted channels on the batch axis, then summed over channels.
#   * first-index argmax over clusters -> assignment one-hot (stays in vregs).
#   * segment sums accumulated straight into the resident OUTPUT refs:
#       prof_ref    += assign (batched over 23 channels) @ one_hot(extra)
#       delmean_ref += assign @ extra_deletion            (f32 matmul, exact here)
# Cluster ("center") rows seed the accumulators at tile 0; normalization at the
# last tile uses denom = 1e-6 + sum_c(prof numerator), which equals the
# reference 1e-6 + msa_mask + segment_sum(extra_mask) because all masks are 1
# in this pipeline and sentinel (-1) entries contribute zero to every channel.
# ---------------------------------------------------------------------------
def _cluster_kernel(c_msa_ref, c_del_ref, e_msa_ref, e_del_ref,
                    prof_ref, delmean_ref):
    t = pl.program_id(1)

    c_msa = c_msa_ref[...]                                    # [Nc, Rp] int32 (pad -1)
    e_msa = e_msa_ref[...].astype(jnp.int32)                  # [T,  Rp] int8 -> int32
    e_del = e_del_ref[...]                                    # [T,  Rp] f32  (pad 0)
    nc, r = c_msa.shape
    tne = e_msa.shape[0]

    # -- init resident output accumulators with the cluster-center contribution
    @pl.when(t == 0)
    def _():
        ch0 = lax.broadcasted_iota(jnp.int32, (NUM_CH, nc, r), 0)
        prof_ref[...] = (ch0 == c_msa[None, :, :]).astype(jnp.float32)   # one_hot(msa,23)
        delmean_ref[...] = c_del_ref[...]                                # deletion_matrix

    # -- one-hot stacks (sentinel -1 never matches a channel; no mask streams)
    ch_e = lax.broadcasted_iota(jnp.int32, (NUM_CH, tne, r), 0)
    eoh = (e_msa[None, :, :] == ch_e).astype(jnp.bfloat16)               # [23, T, Rp]
    ch_c = lax.broadcasted_iota(jnp.int32, (21, nc, r), 0)
    soh = (c_msa[None, :, :] == ch_c).astype(jnp.bfloat16)               # [21, Nc, Rp]

    # -- agreement: one batched MXU contraction over residues (channels 0..20)
    agree_c = jnp.einsum('cnr,ctr->cnt', soh, eoh[:21],
                         preferred_element_type=jnp.float32)             # [21, Nc, T]
    agreement = jnp.sum(agree_c, axis=0)                                 # [Nc, T]
    if GAP_AGREEMENT_WEIGHT != 0.0:
        gap_c = (c_msa == 21).astype(jnp.bfloat16)                       # [Nc, Rp]
        agreement = agreement + GAP_AGREEMENT_WEIGHT * lax.dot_general(
            gap_c, eoh[21], (((1,), (1,)), ((), ())),
            preferred_element_type=jnp.float32)
    # channel 22 (mask token) has weight 0 -> dropped.

    # -- argmax over clusters, first-index tie-break (tf.argmax semantics)
    rows = lax.broadcasted_iota(jnp.int32, (nc, tne), 0)
    maxv = jnp.max(agreement, axis=0, keepdims=True)                     # [1, T]
    first = jnp.min(jnp.where(agreement >= maxv, rows, jnp.int32(2 ** 30)),
                    axis=0, keepdims=True)                               # [1, T]
    assign_t = (rows == first).astype(jnp.bfloat16)                      # [Nc, T]
    # (sentinel/padded rows land in cluster 0 but their one-hots and deletions
    #  are all zero, so they contribute nothing.)

    # -- segment sums, accumulated straight into the resident output refs
    assign_b = jnp.broadcast_to(assign_t[None, :, :], (NUM_CH, nc, tne))
    prof_ref[...] += jnp.einsum('cnt,ctr->cnr', assign_b, eoh,
                                preferred_element_type=jnp.float32)      # [23, Nc, Rp]
    # deletion counts are not 0/1 -> keep this matmul in f32 (exact for small ints)
    delmean_ref[...] += lax.dot_general(
        assign_t.astype(jnp.float32), e_del,
        (((1,), (0,)), ((), ())), preferred_element_type=jnp.float32)    # [Nc, Rp]

    # -- finalize: denom = 1e-6 + sum_c numerator  (== 1e-6 + msa_mask + seg(extra_mask))
    @pl.when(t == pl.num_programs(1) - 1)
    def _():
        prof = prof_ref[...]
        denom = 1e-6 + jnp.sum(prof, axis=0)                             # [Nc, Rp]
        inv = 1.0 / denom
        prof_ref[...] = prof * inv[None, :, :]
        delmean_ref[...] = delmean_ref[...] * inv


def cluster_features(c_msa, c_del, e_msa_i8, e_del, *, tile_ne, vmem_limit):
    """Fused nearest_neighbor_clusters + summarize_clusters over the ensemble."""
    e_dim, nc, rp = c_msa.shape
    nep = e_msa_i8.shape[1]
    assert rp % LANE == 0 and nep % tile_ne == 0 and tile_ne % 32 == 0
    nt = nep // tile_ne

    c_spec = pl.BlockSpec((None, nc, rp), lambda e, t: (e, 0, 0))
    x_spec = pl.BlockSpec((None, tile_ne, rp), lambda e, t: (e, t, 0))
    out_shapes = (jax.ShapeDtypeStruct((e_dim, NUM_CH, nc, rp), jnp.float32),
                  jax.ShapeDtypeStruct((e_dim, nc, rp), jnp.float32))
    out_specs = (pl.BlockSpec((None, NUM_CH, nc, rp), lambda e, t: (e, 0, 0, 0)),
                 pl.BlockSpec((None, nc, rp), lambda e, t: (e, 0, 0)))

    return pl.pallas_call(
        _cluster_kernel,
        out_shape=out_shapes,
        grid_spec=pltpu.PrefetchScalarGridSpec(
            num_scalar_prefetch=0,
            grid=(e_dim, nt),
            in_specs=[c_spec, c_spec, x_spec, x_spec],
            out_specs=out_specs),
        compiler_params=pltpu.CompilerParams(
            dimension_semantics=("parallel", "arbitrary"),
            vmem_limit_bytes=vmem_limit),
    )(c_msa, c_del, e_msa_i8, e_del)


# ---------------------------------------------------------------------------
# Kernel 3: make_msa_feat  (channel-major assembly -> [E, 49, Nc, Rp])
# Concatenation is along a MAJOR axis (no lane shifts); wrapper transposes to
# the reference channel-last [E, Nc, R, 49] layout.
# TODO(synk): full fusion into the cluster-kernel finalize is blocked on an
#             in-kernel arctan for deletion_mean_value (no guaranteed lowering).
# ---------------------------------------------------------------------------
def _msa_feat_kernel(msa_ref, del_ref, delval_ref, prof_ref, dmv_ref, out_ref):
    msa = msa_ref[...]                                        # [Nc, Rp] int32
    dmat = del_ref[...]                                       # [Nc, Rp]
    delval = delval_ref[...]                                  # [Nc, Rp]
    prof = prof_ref[...]                                      # [23, Nc, Rp]
    dmv = dmv_ref[...]                                        # [Nc, Rp]
    nc, r = msa.shape
    ch = lax.broadcasted_iota(jnp.int32, (NUM_CH, nc, r), 0)
    msa_oh = (ch == msa[None, :, :]).astype(jnp.float32)      # [23, Nc, Rp]
    has_del = jnp.clip(dmat, 0.0, 1.0)[None]                  # [1, Nc, Rp]
    out_ref[...] = jnp.concatenate(
        [msa_oh, has_del, delval[None], prof, dmv[None]], axis=0)   # [49, Nc, Rp]


def make_msa_feat(c_msa, c_del, del_val, prof_cm, delmean_val, *, vmem_limit=None):
    e_dim, nc, rp = c_msa.shape
    spec2 = pl.BlockSpec((None, nc, rp), lambda e: (e, 0, 0))
    spec3 = pl.BlockSpec((None, NUM_CH, nc, rp), lambda e: (e, 0, 0, 0))
    out_spec = pl.BlockSpec((None, MSA_FEAT_CH, nc, rp), lambda e: (e, 0, 0, 0))
    feat_cm = pl.pallas_call(
        _msa_feat_kernel,
        out_shape=jax.ShapeDtypeStruct((e_dim, MSA_FEAT_CH, nc, rp), jnp.float32),
        grid_spec=pltpu.PrefetchScalarGridSpec(
            num_scalar_prefetch=0, grid=(e_dim,),
            in_specs=[spec2, spec2, spec2, spec3, spec2],
            out_specs=out_spec),
        compiler_params=pltpu.CompilerParams(
            dimension_semantics=("parallel",),
            vmem_limit_bytes=vmem_limit),
    )(c_msa, c_del, del_val, prof_cm, delmean_val)
    # NOTE: channel-last transpose kept only to match the reference layout;
    # drop it if the consumer can take channel-major features.
    return jnp.transpose(feat_cm, (0, 2, 3, 1))               # [E, Nc, Rp, 49]


# ---------------------------------------------------------------------------
# Kernel 4: target_feat  ([has_break, one_hot(aatype, 21)]); channel-major.
# ---------------------------------------------------------------------------
def _target_feat_kernel(aatype_ref, bsr_ref, out_ref):
    aa = aatype_ref[...]                                      # [1, Rp] int32 (pad -1)
    bsr = bsr_ref[...]                                        # [1, Rp] int32
    r = aa.shape[1]
    has_break = jnp.clip(bsr.astype(jnp.float32), 0.0, 1.0)   # [1, Rp]
    ch = lax.broadcasted_iota(jnp.int32, (21, r), 0)
    aa_oh = (ch == aa).astype(jnp.float32)                    # [21, Rp]
    out_ref[...] = jnp.concatenate([has_break, aa_oh], axis=0)   # [22, Rp]


def make_target_feat(aatype_p, bsr_p):
    rp = aatype_p.shape[0]
    tf_cm = _vmem_call(_target_feat_kernel,
                       jax.ShapeDtypeStruct((22, rp), jnp.float32),
                       aatype_p[None, :].astype(jnp.int32),
                       bsr_p[None, :].astype(jnp.int32))
    return tf_cm.T                                            # [Rp, 22]


# ---------------------------------------------------------------------------
# RNG helper shared by forward() and the self-check
# ---------------------------------------------------------------------------
def _sample_index_order(key, it, n_msa):
    """sample_msa(keep_extra=True): row 0 kept first, rest permuted per recycle."""
    k_it = jax.random.fold_in(key, it)                        # resample_msa_in_recycling
    perm = jax.random.permutation(k_it, jnp.arange(1, n_msa))
    return jnp.concatenate([jnp.zeros((1,), perm.dtype), perm], axis=0)


# ---------------------------------------------------------------------------
# Forward pass (glue mirroring AlphaFoldFeatures.forward)
# ---------------------------------------------------------------------------
def alphafold_features_forward(raw_features, random_seed=0, *,
                               num_recycle=1, max_msa_clusters=8,
                               max_extra_msa=24, tile_ne=None):
    n_res = int(raw_features['seq_length'][0])
    # crop_size == num_res here -> random_crop_to_size / make_fixed_size are identity.

    vmem_limit = _vmem_limit_bytes()
    rp = _round_up(max(n_res, 1), LANE)                       # lane-dense residue axis
    pad_r = rp - n_res

    # correct_msa_restypes (table gather, glue)
    msa = MAP_HHBLITS_AATYPE_TO_OUR_AATYPE[raw_features['msa'].astype(jnp.int32)]
    # squeeze_features: one-hot aatype -> index
    aatype = jnp.argmax(raw_features['aatype'], axis=-1).astype(jnp.int32)
    # deletion_matrix_int -> deletion_matrix (float)
    deletion_matrix = raw_features['deletion_matrix_int'].astype(jnp.float32)
    # randomly_replace_msa_with_unknown(p=0.0) is a no-op.

    n_msa = msa.shape[0]
    e_dim = num_recycle + 1

    # residue padding: sentinel -1 never matches any one-hot channel
    msa_p = jnp.pad(msa, ((0, 0), (0, pad_r)), constant_values=-1)
    del_p = jnp.pad(deletion_matrix, ((0, 0), (0, pad_r)))
    aatype_p = jnp.pad(aatype, (0, pad_r), constant_values=-1)
    bsr_p = jnp.pad(raw_features['between_segment_residues'].astype(jnp.int32),
                    (0, pad_r))

    seq_mask = jnp.ones((n_res,), jnp.float32)                           # make_seq_mask
    hh_profile = hhblits_profile(msa_p, n_msa, vmem_limit=vmem_limit)[:n_res]
    target_feat = make_target_feat(aatype_p, bsr_p)[:n_res]
    # TODO(synk): make_atom14_masks / is_training atom37 frame+torsion transforms
    #             are residue_constants table gathers with no compute hot path; omitted.

    # ---- sample_msa(keep_extra=True) per recycle iteration, stacked over E ----
    key = jax.random.PRNGKey(random_seed)
    c_msa_l, c_del_l, e_msa_l, e_del_l = [], [], [], []
    for it in range(e_dim):
        index_order = _sample_index_order(key, it, n_msa)
        sel, not_sel = index_order[:max_msa_clusters], index_order[max_msa_clusters:]
        c_msa_l.append(msa_p[sel]);      c_del_l.append(del_p[sel])
        e_msa_l.append(msa_p[not_sel]);  e_del_l.append(del_p[not_sel])
        # TODO(synk): make_masked_msa (BERT-style random masking) disabled in this config.

    c_msa_all = jnp.stack(c_msa_l).astype(jnp.int32)          # [E, Nc, Rp]
    c_del_all = jnp.stack(c_del_l)                            # [E, Nc, Rp]
    e_msa_all = jnp.stack(e_msa_l).astype(jnp.int32)          # [E, Ne, Rp]
    e_del_all = jnp.stack(e_del_l)                            # [E, Ne, Rp]

    nc = c_msa_all.shape[1]
    ne = e_msa_all.shape[1]

    # ---- extra-MSA tiling: tile_ne is the main perf knob (raise to 256-512 on
    #      big inputs).  Padded rows use sentinel -1 / deletion 0 -> contribute 0.
    if tile_ne is None:
        tile_ne = min(256, _round_up(max(ne, 1), 32))
    tile_ne = max(32, _round_up(tile_ne, 32))
    nep = max(tile_ne, _round_up(ne, tile_ne))
    e_msa_p8 = jnp.pad(e_msa_all, ((0, 0), (0, nep - ne), (0, 0)),
                       constant_values=-1).astype(jnp.int8)   # int8 stream: 4x less DMA
    e_del_p = jnp.pad(e_del_all, ((0, 0), (0, nep - ne), (0, 0)))

    # ---- fused nearest_neighbor_clusters + summarize_clusters (Pallas) ----
    cluster_profile_cm, cluster_del_mean = cluster_features(
        c_msa_all, c_del_all, e_msa_p8, e_del_p,
        tile_ne=tile_ne, vmem_limit=vmem_limit)               # [E,23,Nc,Rp], [E,Nc,Rp]

    # crop_extra_msa (reference crops AFTER cluster summarization)
    e_msa_c = e_msa_all[:, :max_extra_msa, :n_res]
    e_del_c = e_del_all[:, :max_extra_msa, :n_res]

    # make_msa_feat
    # TODO(synk): jnp.arctan has no guaranteed Mosaic lowering; computed in XLA glue.
    deletion_value = jnp.arctan(c_del_all / 3.0) * (2.0 / jnp.pi)
    deletion_mean_value = jnp.arctan(cluster_del_mean / 3.0) * (2.0 / jnp.pi)
    msa_feat = make_msa_feat(c_msa_all, c_del_all, deletion_value,
                             cluster_profile_cm, deletion_mean_value,
                             vmem_limit=vmem_limit)[:, :, :n_res, :]     # [E,Nc,R,49]

    extra_has_deletion = jnp.clip(e_del_c, 0.0, 1.0)
    extra_deletion_value = jnp.arctan(e_del_c / 3.0) * (2.0 / jnp.pi)

    def _tile_e(x):  # torch.stack over identical per-iteration features
        return jnp.broadcast_to(x[None], (e_dim,) + x.shape)

    return {
        'aatype': _tile_e(aatype),
        'residue_index': _tile_e(raw_features['residue_index'].astype(jnp.int32)),
        'seq_mask': _tile_e(seq_mask),
        'msa_mask': jnp.ones((e_dim, nc, n_res), jnp.float32),
        'msa_row_mask': jnp.ones((e_dim, nc), jnp.float32),
        'msa_feat': msa_feat,
        'target_feat': _tile_e(target_feat),
        'extra_msa': e_msa_c,
        'extra_msa_mask': jnp.ones(e_del_c.shape, jnp.float32),
        'extra_has_deletion': extra_has_deletion,
        'extra_deletion_value': extra_deletion_value,
        'hhblits_profile': _tile_e(hh_profile),
    }


# ---------------------------------------------------------------------------
# main
# ---------------------------------------------------------------------------
if __name__ == "__main__":
    N_RES, N_MSA = 16, 32
    NUM_RECYCLE, MAX_CLUSTERS, MAX_EXTRA = 1, 8, 24
    key = jax.random.PRNGKey(0)
    k1, k2, k3 = jax.random.split(key, 3)

    aatype_idx = jax.random.randint(k1, (N_RES,), 0, 21)
    raw_features = {
        'aatype': jax.nn.one_hot(aatype_idx, 21, dtype=jnp.float32),      # [R, 21]
        'between_segment_residues': jnp.zeros((N_RES,), jnp.int32),       # [R]
        'residue_index': jnp.arange(N_RES, dtype=jnp.int32),              # [R]
        'seq_length': jnp.full((N_RES,), N_RES, jnp.int32),               # [R]
        'msa': jax.random.randint(k2, (N_MSA, N_RES), 0, 22),             # [M, R]
        'deletion_matrix_int': jax.random.randint(k3, (N_MSA, N_RES), 0, 6),
    }

    feats = alphafold_features_forward(raw_features, random_seed=0,
                                       num_recycle=NUM_RECYCLE,
                                       max_msa_clusters=MAX_CLUSTERS,
                                       max_extra_msa=MAX_EXTRA)
    jax.block_until_ready(feats['msa_feat'])
    jax.block_until_ready(feats['target_feat'])

    E = NUM_RECYCLE + 1
    assert feats['msa_feat'].shape == (E, MAX_CLUSTERS, N_RES, MSA_FEAT_CH)
    assert feats['target_feat'].shape == (E, N_RES, 22)
    assert feats['hhblits_profile'].shape == (E, N_RES, 22)
    assert feats['extra_msa'].shape == (E, MAX_EXTRA, N_RES)

    # ---- pure-JAX reference check of the Pallas hot path ----
    msa_r = MAP_HHBLITS_AATYPE_TO_OUR_AATYPE[raw_features['msa'].astype(jnp.int32)]
    del_r = raw_features['deletion_matrix_int'].astype(jnp.float32)
    hh_ref = jnp.mean(jax.nn.one_hot(msa_r, HH_CH, dtype=jnp.float32), axis=0)
    np.testing.assert_allclose(np.asarray(feats['hhblits_profile'][0]),
                               np.asarray(hh_ref), atol=1e-5, rtol=1e-5)

    fkey = jax.random.PRNGKey(0)
    for e in range(E):
        order = _sample_index_order(fkey, e, N_MSA)
        sel, nsel = order[:MAX_CLUSTERS], order[MAX_CLUSTERS:]
        c_m, c_d = msa_r[sel], del_r[sel]
        x_m, x_d = msa_r[nsel], del_r[nsel]
        weights = jnp.array([1.0] * 21 + [GAP_AGREEMENT_WEIGHT, 0.0], jnp.float32)
        c_oh = jax.nn.one_hot(c_m, NUM_CH, dtype=jnp.float32)
        x_oh = jax.nn.one_hot(x_m, NUM_CH, dtype=jnp.float32)
        agree = jnp.einsum('nrc,mrc->mn', c_oh * weights, x_oh)          # [Ne, Nc]
        seg = jax.nn.one_hot(jnp.argmax(agree, axis=1), MAX_CLUSTERS,
                             dtype=jnp.float32).T                        # [Nc, Ne]
        counts = 1e-6 + 1.0 + jnp.einsum('nm,mr->nr', seg, jnp.ones_like(x_d))
        prof_ref = (jnp.einsum('nm,mrc->nrc', seg, x_oh) + c_oh) / counts[..., None]
        dmean_ref = (jnp.einsum('nm,mr->nr', seg, x_d) + c_d) / counts
        np.testing.assert_allclose(np.asarray(feats['msa_feat'][e][:, :, 25:48]),
                                   np.asarray(prof_ref), atol=1e-5, rtol=1e-5)
        np.testing.assert_allclose(
            np.asarray(feats['msa_feat'][e][:, :, 48]),
            np.asarray(jnp.arctan(dmean_ref / 3.0) * (2.0 / jnp.pi)),
            atol=1e-5, rtol=1e-5)

    print("KERNEL_OK")
</pallas_src>

<mosaic_0001>
module attributes {stable_mosaic.version = 11 : i64} {
  func.func @_hhblits_profile_kernel(%arg0: i32, %arg1: memref<32x128xi32, #tpu.memory_space<vmem>>, %arg2: memref<22x128xf32, #tpu.memory_space<vmem>>) attributes {dimension_semantics = [#tpu.dimension_semantics<arbitrary>], iteration_bounds = array<i64: 1>, scalar_prefetch = 0 : i64, scratch_operands = 0 : i64, tpu.core_type = #tpu.core_type<tc>, window_params = [{transform_indices = @transform_0, window_bounds = array<i64: 32, 128>}, {pipeline_mode = #tpu.pipeline_mode<synchronous>, transform_indices = @transform_1, window_bounds = array<i64: 22, 128>}]} {
    %c0_i32 = arith.constant 0 : i32
    %0 = arith.cmpi eq, %arg0, %c0_i32 : i32
    %1 = arith.extui %0 : i1 to i32
    %c0_i32_0 = arith.constant 0 : i32
    %2 = arith.cmpi ne, %1, %c0_i32_0 : i32
    scf.if %2 {
      %cst_93 = arith.constant 0.000000e+00 : f32
      %205 = vector.broadcast %cst_93 : f32 to vector<22x128xf32>
      %c0_94 = arith.constant 0 : index
      %c0_95 = arith.constant 0 : index
      %206 = vector.load %arg2[%c0_94, %c0_95] : memref<22x128xf32, #tpu.memory_space<vmem>>, vector<22x128xf32>
      tpu.vector_store %arg2[%c0_94, %c0_95], %205 {strides = array<i32>} : memref<22x128xf32, #tpu.memory_space<vmem>>, vector<22x128xf32>,
    } else {
    }
    %c0 = arith.constant 0 : index
    %c0_1 = arith.constant 0 : index
    %3 = vector.load %arg1[%c0, %c0_1] : memref<32x128xi32, #tpu.memory_space<vmem>>, vector<32x128xi32>
    %c0_i32_2 = arith.constant 0 : i32
    %4 = vector.broadcast %c0_i32_2 : i32 to vector<32x128xi32>
    %5 = arith.cmpi eq, %3, %4 : vector<32x128xi32>
    %6 = arith.extui %5 : vector<32x128xi1> to vector<32x128xi32>
    %7 = arith.sitofp %6 : vector<32x128xi32> to vector<32x128xf32>
    %cst = arith.constant dense<0.000000e+00> : vector<128xf32>
    %8 = vector.multi_reduction <add>, %7, %cst [0] : vector<32x128xf32> to vector<128xf32>
    %9 = vector.shape_cast %8 : vector<128xf32> to vector<1x128xf32>
    %c0_3 = arith.constant 0 : index
    %c0_4 = arith.constant 0 : index
    %10 = vector.load %arg2[%c0_3, %c0_4] : memref<22x128xf32, #tpu.memory_space<vmem>>, vector<1x128xf32>
    %11 = arith.addf %10, %9 : vector<1x128xf32>
    %c0_5 = arith.constant 0 : index
    %c0_6 = arith.constant 0 : index
    %12 = vector.load %arg2[%c0_5, %c0_6] : memref<22x128xf32, #tpu.memory_space<vmem>>, vector<1x128xf32>
    tpu.vector_store %arg2[%c0_5, %c0_6], %11 {strides = array<i32>} : memref<22x128xf32, #tpu.memory_space<vmem>>, vector<1x128xf32>,
    %c1_i32 = arith.constant 1 : i32
    %13 = vector.broadcast %c1_i32 : i32 to vector<32x128xi32>
    %14 = arith.cmpi eq, %3, %13 : vector<32x128xi32>
    %15 = arith.extui %14 : vector<32x128xi1> to vector<32x128xi32>
    %16 = arith.sitofp %15 : vector<32x128xi32> to vector<32x128xf32>
    %cst_7 = arith.constant dense<0.000000e+00> : vector<128xf32>
    %17 = vector.multi_reduction <add>, %16, %cst_7 [0] : vector<32x128xf32> to vector<128xf32>
    %18 = vector.shape_cast %17 : vector<128xf32> to vector<1x128xf32>
    %c1 = arith.constant 1 : index
    %c0_8 = arith.constant 0 : index
    %19 = vector.load %arg2[%c1, %c0_8] : memref<22x128xf32, #tpu.memory_space<vmem>>, vector<1x128xf32>
    %20 = arith.addf %19, %18 : vector<1x128xf32>
    %c1_9 = arith.constant 1 : index
    %c0_10 = arith.constant 0 : index
    %21 = vector.load %arg2[%c1_9, %c0_10] : memref<22x128xf32, #tpu.memory_space<vmem>>, vector<1x128xf32>
    tpu.vector_store %arg2[%c1_9, %c0_10], %20 {strides = array<i32>} : memref<22x128xf32, #tpu.memory_space<vmem>>, vector<1x128xf32>,
    %c2_i32 = arith.constant 2 : i32
    %22 = vector.broadcast %c2_i32 : i32 to vector<32x128xi32>
    %23 = arith.cmpi eq, %3, %22 : vector<32x128xi32>
    %24 = arith.extui %23 : vector<32x128xi1> to vector<32x128xi32>
    %25 = arith.sitofp %24 : vector<32x128xi32> to vector<32x128xf32>
    %cst_11 = arith.constant dense<0.000000e+00> : vector<128xf32>
    %26 = vector.multi_reduction <add>, %25, %cst_11 [0] : vector<32x128xf32> to vector<128xf32>
    %27 = vector.shape_cast %26 : vector<128xf32> to vector<1x128xf32>
    %c2 = arith.constant 2 : index
    %c0_12 = arith.constant 0 : index
    %28 = vector.load %arg2[%c2, %c0_12] : memref<22x128xf32, #tpu.memory_space<vmem>>, vector<1x128xf32>
    %29 = arith.addf %28, %27 : vector<1x128xf32>
    %c2_13 = arith.constant 2 : index
    %c0_14 = arith.constant 0 : index
    %30 = vector.load %arg2[%c2_13, %c0_14] : memref<22x128xf32, #tpu.memory_space<vmem>>, vector<1x128xf32>
    tpu.vector_store %arg2[%c2_13, %c0_14], %29 {strides = array<i32>} : memref<22x128xf32, #tpu.memory_space<vmem>>, vector<1x128xf32>,
    %c3_i32 = arith.constant 3 : i32
    %31 = vector.broadcast %c3_i32 : i32 to vector<32x128xi32>
    %32 = arith.cmpi eq, %3, %31 : vector<32x128xi32>
    %33 = arith.extui %32 : vector<32x128xi1> to vector<32x128xi32>
    %34 = arith.sitofp %33 : vector<32x128xi32> to vector<32x128xf32>
    %cst_15 = arith.constant dense<0.000000e+00> : vector<128xf32>
    %35 = vector.multi_reduction <add>, %34, %cst_15 [0] : vector<32x128xf32> to vector<128xf32>
    %36 = vector.shape_cast %35 : vector<128xf32> to vector<1x128xf32>
    %c3 = arith.constant 3 : index
    %c0_16 = arith.constant 0 : index
    %37 = vector.load %arg2[%c3, %c0_16] : memref<22x128xf32, #tpu.memory_space<vmem>>, vector<1x128xf32>
    %38 = arith.addf %37, %36 : vector<1x128xf32>
    %c3_17 = arith.constant 3 : index
    %c0_18 = arith.constant 0 : index
    %39 = vector.load %arg2[%c3_17, %c0_18] : memref<22x128xf32, #tpu.memory_space<vmem>>, vector<1x128xf32>
    tpu.vector_store %arg2[%c3_17, %c0_18], %38 {strides = array<i32>} : memref<22x128xf32, #tpu.memory_space<vmem>>, vector<1x128xf32>,
    %c4_i32 = arith.constant 4 : i32
    %40 = vector.broadcast %c4_i32 : i32 to vector<32x128xi32>
    %41 = arith.cmpi eq, %3, %40 : vector<32x128xi32>
    %42 = arith.extui %41 : vector<32x128xi1> to vector<32x128xi32>
    %43 = arith.sitofp %42 : vector<32x128xi32> to vector<32x128xf32>
    %cst_19 = arith.constant dense<0.000000e+00> : vector<128xf32>
    %44 = vector.multi_reduction <add>, %43, %cst_19 [0] : vector<32x128xf32> to vector<128xf32>
    %45 = vector.shape_cast %44 : vector<128xf32> to vector<1x128xf32>
    %c4 = arith.constant 4 : index
    %c0_20 = arith.constant 0 : index
    %46 = vector.load %arg2[%c4, %c0_20] : memref<22x128xf32, #tpu.memory_space<vmem>>, vector<1x128xf32>
    %47 = arith.addf %46, %45 : vector<1x128xf32>
    %c4_21 = arith.constant 4 : index
    %c0_22 = arith.constant 0 : index
    %48 = vector.load %arg2[%c4_21, %c0_22] : memref<22x128xf32, #tpu.memory_space<vmem>>, vector<1x128xf32>
    tpu.vector_store %arg2[%c4_21, %c0_22], %47 {strides = array<i32>} : memref<22x128xf32, #tpu.memory_space<vmem>>, vector<1x128xf32>,
    %c5_i32 = arith.constant 5 : i32
    %49 = vector.broadcast %c5_i32 : i32 to vector<32x128xi32>
    %50 = arith.cmpi eq, %3, %49 : vector<32x128xi32>
    %51 = arith.extui %50 : vector<32x128xi1> to vector<32x128xi32>
    %52 = arith.sitofp %51 : vector<32x128xi32> to vector<32x128xf32>
    %cst_23 = arith.constant dense<0.000000e+00> : vector<128xf32>
    %53 = vector.multi_reduction <add>, %52, %cst_23 [0] : vector<32x128xf32> to vector<128xf32>
    %54 = vector.shape_cast %53 : vector<128xf32> to vector<1x128xf32>
    %c5 = arith.constant 5 : index
    %c0_24 = arith.constant 0 : index
    %55 = vector.load %arg2[%c5, %c0_24] : memref<22x128xf32, #tpu.memory_space<vmem>>, vector<1x128xf32>
    %56 = arith.addf %55, %54 : vector<1x128xf32>
    %c5_25 = arith.constant 5 : index
    %c0_26 = arith.constant 0 : index
    %57 = vector.load %arg2[%c5_25, %c0_26] : memref<22x128xf32, #tpu.memory_space<vmem>>, vector<1x128xf32>
    tpu.vector_store %arg2[%c5_25, %c0_26], %56 {strides = array<i32>} : memref<22x128xf32, #tpu.memory_space<vmem>>, vector<1x128xf32>,
    %c6_i32 = arith.constant 6 : i32
    %58 = vector.broadcast %c6_i32 : i32 to vector<32x128xi32>
    %59 = arith.cmpi eq, %3, %58 : vector<32x128xi32>
    %60 = arith.extui %59 : vector<32x128xi1> to vector<32x128xi32>
    %61 = arith.sitofp %60 : vector<32x128xi32> to vector<32x128xf32>
    %cst_27 = arith.constant dense<0.000000e+00> : vector<128xf32>
    %62 = vector.multi_reduction <add>, %61, %cst_27 [0] : vector<32x128xf32> to vector<128xf32>
    %63 = vector.shape_cast %62 : vector<128xf32> to vector<1x128xf32>
    %c6 = arith.constant 6 : index
    %c0_28 = arith.constant 0 : index
    %64 = vector.load %arg2[%c6, %c0_28] : memref<22x128xf32, #tpu.memory_space<vmem>>, vector<1x128xf32>
    %65 = arith.addf %64, %63 : vector<1x128xf32>
    %c6_29 = arith.constant 6 : index
    %c0_30 = arith.constant 0 : index
    %66 = vector.load %arg2[%c6_29, %c0_30] : memref<22x128xf32, #tpu.memory_space<vmem>>, vector<1x128xf32>
    tpu.vector_store %arg2[%c6_29, %c0_30], %65 {strides = array<i32>} : memref<22x128xf32, #tpu.memory_space<vmem>>, vector<1x128xf32>,
    %c7_i32 = arith.constant 7 : i32
    %67 = vector.broadcast %c7_i32 : i32 to vector<32x128xi32>
    %68 = arith.cmpi eq, %3, %67 : vector<32x128xi32>
    %69 = arith.extui %68 : vector<32x128xi1> to vector<32x128xi32>
    %70 = arith.sitofp %69 : vector<32x128xi32> to vector<32x128xf32>
    %cst_31 = arith.constant dense<0.000000e+00> : vector<128xf32>
    %71 = vector.multi_reduction <add>, %70, %cst_31 [0] : vector<32x128xf32> to vector<128xf32>
    %72 = vector.shape_cast %71 : vector<128xf32> to vector<1x128xf32>
    %c7 = arith.constant 7 : index
    %c0_32 = arith.constant 0 : index
    %73 = vector.load %arg2[%c7, %c0_32] : memref<22x128xf32, #tpu.memory_space<vmem>>, vector<1x128xf32>
    %74 = arith.addf %73, %72 : vector<1x128xf32>
    %c7_33 = arith.constant 7 : index
    %c0_34 = arith.constant 0 : index
    %75 = vector.load %arg2[%c7_33, %c0_34] : memref<22x128xf32, #tpu.memory_space<vmem>>, vector<1x128xf32>
    tpu.vector_store %arg2[%c7_33, %c0_34], %74 {strides = array<i32>} : memref<22x128xf32, #tpu.memory_space<vmem>>, vector<1x128xf32>,
    %c8_i32 = arith.constant 8 : i32
    %76 = vector.broadcast %c8_i32 : i32 to vector<32x128xi32>
    %77 = arith.cmpi eq, %3, %76 : vector<32x128xi32>
    %78 = arith.extui %77 : vector<32x128xi1> to vector<32x128xi32>
    %79 = arith.sitofp %78 : vector<32x128xi32> to vector<32x128xf32>
    %cst_35 = arith.constant dense<0.000000e+00> : vector<128xf32>
    %80 = vector.multi_reduction <add>, %79, %cst_35 [0] : vector<32x128xf32> to vector<128xf32>
    %81 = vector.shape_cast %80 : vector<128xf32> to vector<1x128xf32>
    %c8 = arith.constant 8 : index
    %c0_36 = arith.constant 0 : index
    %82 = vector.load %arg2[%c8, %c0_36] : memref<22x128xf32, #tpu.memory_space<vmem>>, vector<1x128xf32>
    %83 = arith.addf %82, %81 : vector<1x128xf32>
    %c8_37 = arith.constant 8 : index
    %c0_38 = arith.constant 0 : index
    %84 = vector.load %arg2[%c8_37, %c0_38] : memref<22x128xf32, #tpu.memory_space<vmem>>, vector<1x128xf32>
    tpu.vector_store %arg2[%c8_37, %c0_38], %83 {strides = array<i32>} : memref<22x128xf32, #tpu.memory_space<vmem>>, vector<1x128xf32>,
    %c9_i32 = arith.constant 9 : i32
    %85 = vector.broadcast %c9_i32 : i32 to vector<32x128xi32>
    %86 = arith.cmpi eq, %3, %85 : vector<32x128xi32>
    %87 = arith.extui %86 : vector<32x128xi1> to vector<32x128xi32>
    %88 = arith.sitofp %87 : vector<32x128xi32> to vector<32x128xf32>
    %cst_39 = arith.constant dense<0.000000e+00> : vector<128xf32>
    %89 = vector.multi_reduction <add>, %88, %cst_39 [0] : vector<32x128xf32> to vector<128xf32>
    %90 = vector.shape_cast %89 : vector<128xf32> to vector<1x128xf32>
    %c9 = arith.constant 9 : index
    %c0_40 = arith.constant 0 : index
    %91 = vector.load %arg2[%c9, %c0_40] : memref<22x128xf32, #tpu.memory_space<vmem>>, vector<1x128xf32>
    %92 = arith.addf %91, %90 : vector<1x128xf32>
    %c9_41 = arith.constant 9 : index
    %c0_42 = arith.constant 0 : index
    %93 = vector.load %arg2[%c9_41, %c0_42] : memref<22x128xf32, #tpu.memory_space<vmem>>, vector<1x128xf32>
    tpu.vector_store %arg2[%c9_41, %c0_42], %92 {strides = array<i32>} : memref<22x128xf32, #tpu.memory_space<vmem>>, vector<1x128xf32>,
    %c10_i32 = arith.constant 10 : i32
    %94 = vector.broadcast %c10_i32 : i32 to vector<32x128xi32>
    %95 = arith.cmpi eq, %3, %94 : vector<32x128xi32>
    %96 = arith.extui %95 : vector<32x128xi1> to vector<32x128xi32>
    %97 = arith.sitofp %96 : vector<32x128xi32> to vector<32x128xf32>
    %cst_43 = arith.constant dense<0.000000e+00> : vector<128xf32>
    %98 = vector.multi_reduction <add>, %97, %cst_43 [0] : vector<32x128xf32> to vector<128xf32>
    %99 = vector.shape_cast %98 : vector<128xf32> to vector<1x128xf32>
    %c10 = arith.constant 10 : index
    %c0_44 = arith.constant 0 : index
    %100 = vector.load %arg2[%c10, %c0_44] : memref<22x128xf32, #tpu.memory_space<vmem>>, vector<1x128xf32>
    %101 = arith.addf %100, %99 : vector<1x128xf32>
    %c10_45 = arith.constant 10 : index
    %c0_46 = arith.constant 0 : index
    %102 = vector.load %arg2[%c10_45, %c0_46] : memref<22x128xf32, #tpu.memory_space<vmem>>, vector<1x128xf32>
    tpu.vector_store %arg2[%c10_45, %c0_46], %101 {strides = array<i32>} : memref<22x128xf32, #tpu.memory_space<vmem>>, vector<1x128xf32>,
    %c11_i32 = arith.constant 11 : i32
    %103 = vector.broadcast %c11_i32 : i32 to vector<32x128xi32>
    %104 = arith.cmpi eq, %3, %103 : vector<32x128xi32>
    %105 = arith.extui %104 : vector<32x128xi1> to vector<32x128xi32>
    %106 = arith.sitofp %105 : vector<32x128xi32> to vector<32x128xf32>
    %cst_47 = arith.constant dense<0.000000e+00> : vector<128xf32>
    %107 = vector.multi_reduction <add>, %106, %cst_47 [0] : vector<32x128xf32> to vector<128xf32>
    %108 = vector.shape_cast %107 : vector<128xf32> to vector<1x128xf32>
    %c11 = arith.constant 11 : index
    %c0_48 = arith.constant 0 : index
    %109 = vector.load %arg2[%c11, %c0_48] : memref<22x128xf32, #tpu.memory_space<vmem>>, vector<1x128xf32>
    %110 = arith.addf %109, %108 : vector<1x128xf32>
    %c11_49 = arith.constant 11 : index
    %c0_50 = arith.constant 0 : index
    %111 = vector.load %arg2[%c11_49, %c0_50] : memref<22x128xf32, #tpu.memory_space<vmem>>, vector<1x128xf32>
    tpu.vector_store %arg2[%c11_49, %c0_50], %110 {strides = array<i32>} : memref<22x128xf32, #tpu.memory_space<vmem>>, vector<1x128xf32>,
    %c12_i32 = arith.constant 12 : i32
    %112 = vector.broadcast %c12_i32 : i32 to vector<32x128xi32>
    %113 = arith.cmpi eq, %3, %112 : vector<32x128xi32>
    %114 = arith.extui %113 : vector<32x128xi1> to vector<32x128xi32>
    %115 = arith.sitofp %114 : vector<32x128xi32> to vector<32x128xf32>
    %cst_51 = arith.constant dense<0.000000e+00> : vector<128xf32>
    %116 = vector.multi_reduction <add>, %115, %cst_51 [0] : vector<32x128xf32> to vector<128xf32>
    %117 = vector.shape_cast %116 : vector<128xf32> to vector<1x128xf32>
    %c12 = arith.constant 12 : index
    %c0_52 = arith.constant 0 : index
    %118 = vector.load %arg2[%c12, %c0_52] : memref<22x128xf32, #tpu.memory_space<vmem>>, vector<1x128xf32>
    %119 = arith.addf %118, %117 : vector<1x128xf32>
    %c12_53 = arith.constant 12 : index
    %c0_54 = arith.constant 0 : index
    %120 = vector.load %arg2[%c12_53, %c0_54] : memref<22x128xf32, #tpu.memory_space<vmem>>, vector<1x128xf32>
    tpu.vector_store %arg2[%c12_53, %c0_54], %119 {strides = array<i32>} : memref<22x128xf32, #tpu.memory_space<vmem>>, vector<1x128xf32>,
    %c13_i32 = arith.constant 13 : i32
    %121 = vector.broadcast %c13_i32 : i32 to vector<32x128xi32>
    %122 = arith.cmpi eq, %3, %121 : vector<32x128xi32>
    %123 = arith.extui %122 : vector<32x128xi1> to vector<32x128xi32>
    %124 = arith.sitofp %123 : vector<32x128xi32> to vector<32x128xf32>
    %cst_55 = arith.constant dense<0.000000e+00> : vector<128xf32>
    %125 = vector.multi_reduction <add>, %124, %cst_55 [0] : vector<32x128xf32> to vector<128xf32>
    %126 = vector.shape_cast %125 : vector<128xf32> to vector<1x128xf32>
    %c13 = arith.constant 13 : index
    %c0_56 = arith.constant 0 : index
    %127 = vector.load %arg2[%c13, %c0_56] : memref<22x128xf32, #tpu.memory_space<vmem>>, vector<1x128xf32>
    %128 = arith.addf %127, %126 : vector<1x128xf32>
    %c13_57 = arith.constant 13 : index
    %c0_58 = arith.constant 0 : index
    %129 = vector.load %arg2[%c13_57, %c0_58] : memref<22x128xf32, #tpu.memory_space<vmem>>, vector<1x128xf32>
    tpu.vector_store %arg2[%c13_57, %c0_58], %128 {strides = array<i32>} : memref<22x128xf32, #tpu.memory_space<vmem>>, vector<1x128xf32>,
    %c14_i32 = arith.constant 14 : i32
    %130 = vector.broadcast %c14_i32 : i32 to vector<32x128xi32>
    %131 = arith.cmpi eq, %3, %130 : vector<32x128xi32>
    %132 = arith.extui %131 : vector<32x128xi1> to vector<32x128xi32>
    %133 = arith.sitofp %132 : vector<32x128xi32> to vector<32x128xf32>
    %cst_59 = arith.constant dense<0.000000e+00> : vector<128xf32>
    %134 = vector.multi_reduction <add>, %133, %cst_59 [0] : vector<32x128xf32> to vector<128xf32>
    %135 = vector.shape_cast %134 : vector<128xf32> to vector<1x128xf32>
    %c14 = arith.constant 14 : index
    %c0_60 = arith.constant 0 : index
    %136 = vector.load %arg2[%c14, %c0_60] : memref<22x128xf32, #tpu.memory_space<vmem>>, vector<1x128xf32>
    %137 = arith.addf %136, %135 : vector<1x128xf32>
    %c14_61 = arith.constant 14 : index
    %c0_62 = arith.constant 0 : index
    %138 = vector.load %arg2[%c14_61, %c0_62] : memref<22x128xf32, #tpu.memory_space<vmem>>, vector<1x128xf32>
    tpu.vector_store %arg2[%c14_61, %c0_62], %137 {strides = array<i32>} : memref<22x128xf32, #tpu.memory_space<vmem>>, vector<1x128xf32>,
    %c15_i32 = arith.constant 15 : i32
    %139 = vector.broadcast %c15_i32 : i32 to vector<32x128xi32>
    %140 = arith.cmpi eq, %3, %139 : vector<32x128xi32>
    %141 = arith.extui %140 : vector<32x128xi1> to vector<32x128xi32>
    %142 = arith.sitofp %141 : vector<32x128xi32> to vector<32x128xf32>
    %cst_63 = arith.constant dense<0.000000e+00> : vector<128xf32>
    %143 = vector.multi_reduction <add>, %142, %cst_63 [0] : vector<32x128xf32> to vector<128xf32>
    %144 = vector.shape_cast %143 : vector<128xf32> to vector<1x128xf32>
    %c15 = arith.constant 15 : index
    %c0_64 = arith.constant 0 : index
    %145 = vector.load %arg2[%c15, %c0_64] : memref<22x128xf32, #tpu.memory_space<vmem>>, vector<1x128xf32>
    %146 = arith.addf %145, %144 : vector<1x128xf32>
    %c15_65 = arith.constant 15 : index
    %c0_66 = arith.constant 0 : index
    %147 = vector.load %arg2[%c15_65, %c0_66] : memref<22x128xf32, #tpu.memory_space<vmem>>, vector<1x128xf32>
    tpu.vector_store %arg2[%c15_65, %c0_66], %146 {strides = array<i32>} : memref<22x128xf32, #tpu.memory_space<vmem>>, vector<1x128xf32>,
    %c16_i32 = arith.constant 16 : i32
    %148 = vector.broadcast %c16_i32 : i32 to vector<32x128xi32>
    %149 = arith.cmpi eq, %3, %148 : vector<32x128xi32>
    %150 = arith.extui %149 : vector<32x128xi1> to vector<32x128xi32>
    %151 = arith.sitofp %150 : vector<32x128xi32> to vector<32x128xf32>
    %cst_67 = arith.constant dense<0.000000e+00> : vector<128xf32>
    %152 = vector.multi_reduction <add>, %151, %cst_67 [0] : vector<32x128xf32> to vector<128xf32>
    %153 = vector.shape_cast %152 : vector<128xf32> to vector<1x128xf32>
    %c16 = arith.constant 16 : index
    %c0_68 = arith.constant 0 : index
    %154 = vector.load %arg2[%c16, %c0_68] : memref<22x128xf32, #tpu.memory_space<vmem>>, vector<1x128xf32>
    %155 = arith.addf %154, %153 : vector<1x128xf32>
    %c16_69 = arith.constant 16 : index
    %c0_70 = arith.constant 0 : index
    %156 = vector.load %arg2[%c16_69, %c0_70] : memref<22x128xf32, #tpu.memory_space<vmem>>, vector<1x128xf32>
    tpu.vector_store %arg2[%c16_69, %c0_70], %155 {strides = array<i32>} : memref<22x128xf32, #tpu.memory_space<vmem>>, vector<1x128xf32>,
    %c17_i32 = arith.constant 17 : i32
    %157 = vector.broadcast %c17_i32 : i32 to vector<32x128xi32>
    %158 = arith.cmpi eq, %3, %157 : vector<32x128xi32>
    %159 = arith.extui %158 : vector<32x128xi1> to vector<32x128xi32>
    %160 = arith.sitofp %159 : vector<32x128xi32> to vector<32x128xf32>
    %cst_71 = arith.constant dense<0.000000e+00> : vector<128xf32>
    %161 = vector.multi_reduction <add>, %160, %cst_71 [0] : vector<32x128xf32> to vector<128xf32>
    %162 = vector.shape_cast %161 : vector<128xf32> to vector<1x128xf32>
    %c17 = arith.constant 17 : index
    %c0_72 = arith.constant 0 : index
    %163 = vector.load %arg2[%c17, %c0_72] : memref<22x128xf32, #tpu.memory_space<vmem>>, vector<1x128xf32>
    %164 = arith.addf %163, %162 : vector<1x128xf32>
    %c17_73 = arith.constant 17 : index
    %c0_74 = arith.constant 0 : index
    %165 = vector.load %arg2[%c17_73, %c0_74] : memref<22x128xf32, #tpu.memory_space<vmem>>, vector<1x128xf32>
    tpu.vector_store %arg2[%c17_73, %c0_74], %164 {strides = array<i32>} : memref<22x128xf32, #tpu.memory_space<vmem>>, vector<1x128xf32>,
    %c18_i32 = arith.constant 18 : i32
    %166 = vector.broadcast %c18_i32 : i32 to vector<32x128xi32>
    %167 = arith.cmpi eq, %3, %166 : vector<32x128xi32>
    %168 = arith.extui %167 : vector<32x128xi1> to vector<32x128xi32>
    %169 = arith.sitofp %168 : vector<32x128xi32> to vector<32x128xf32>
    %cst_75 = arith.constant dense<0.000000e+00> : vector<128xf32>
    %170 = vector.multi_reduction <add>, %169, %cst_75 [0] : vector<32x128xf32> to vector<128xf32>
    %171 = vector.shape_cast %170 : vector<128xf32> to vector<1x128xf32>
    %c18 = arith.constant 18 : index
    %c0_76 = arith.constant 0 : index
    %172 = vector.load %arg2[%c18, %c0_76] : memref<22x128xf32, #tpu.memory_space<vmem>>, vector<1x128xf32>
    %173 = arith.addf %172, %171 : vector<1x128xf32>
    %c18_77 = arith.constant 18 : index
    %c0_78 = arith.constant 0 : index
    %174 = vector.load %arg2[%c18_77, %c0_78] : memref<22x128xf32, #tpu.memory_space<vmem>>, vector<1x128xf32>
    tpu.vector_store %arg2[%c18_77, %c0_78], %173 {strides = array<i32>} : memref<22x128xf32, #tpu.memory_space<vmem>>, vector<1x128xf32>,
    %c19_i32 = arith.constant 19 : i32
    %175 = vector.broadcast %c19_i32 : i32 to vector<32x128xi32>
    %176 = arith.cmpi eq, %3, %175 : vector<32x128xi32>
    %177 = arith.extui %176 : vector<32x128xi1> to vector<32x128xi32>
    %178 = arith.sitofp %177 : vector<32x128xi32> to vector<32x128xf32>
    %cst_79 = arith.constant dense<0.000000e+00> : vector<128xf32>
    %179 = vector.multi_reduction <add>, %178, %cst_79 [0] : vector<32x128xf32> to vector<128xf32>
    %180 = vector.shape_cast %179 : vector<128xf32> to vector<1x128xf32>
    %c19 = arith.constant 19 : index
    %c0_80 = arith.constant 0 : index
    %181 = vector.load %arg2[%c19, %c0_80] : memref<22x128xf32, #tpu.memory_space<vmem>>, vector<1x128xf32>
    %182 = arith.addf %181, %180 : vector<1x128xf32>
    %c19_81 = arith.constant 19 : index
    %c0_82 = arith.constant 0 : index
    %183 = vector.load %arg2[%c19_81, %c0_82] : memref<22x128xf32, #tpu.memory_space<vmem>>, vector<1x128xf32>
    tpu.vector_store %arg2[%c19_81, %c0_82], %182 {strides = array<i32>} : memref<22x128xf32, #tpu.memory_space<vmem>>, vector<1x128xf32>,
    %c20_i32 = arith.constant 20 : i32
    %184 = vector.broadcast %c20_i32 : i32 to vector<32x128xi32>
    %185 = arith.cmpi eq, %3, %184 : vector<32x128xi32>
    %186 = arith.extui %185 : vector<32x128xi1> to vector<32x128xi32>
    %187 = arith.sitofp %186 : vector<32x128xi32> to vector<32x128xf32>
    %cst_83 = arith.constant dense<0.000000e+00> : vector<128xf32>
    %188 = vector.multi_reduction <add>, %187, %cst_83 [0] : vector<32x128xf32> to vector<128xf32>
    %189 = vector.shape_cast %188 : vector<128xf32> to vector<1x128xf32>
    %c20 = arith.constant 20 : index
    %c0_84 = arith.constant 0 : index
    %190 = vector.load %arg2[%c20, %c0_84] : memref<22x128xf32, #tpu.memory_space<vmem>>, vector<1x128xf32>
    %191 = arith.addf %190, %189 : vector<1x128xf32>
    %c20_85 = arith.constant 20 : index
    %c0_86 = arith.constant 0 : index
    %192 = vector.load %arg2[%c20_85, %c0_86] : memref<22x128xf32, #tpu.memory_space<vmem>>, vector<1x128xf32>
    tpu.vector_store %arg2[%c20_85, %c0_86], %191 {strides = array<i32>} : memref<22x128xf32, #tpu.memory_space<vmem>>, vector<1x128xf32>,
    %c21_i32 = arith.constant 21 : i32
    %193 = vector.broadcast %c21_i32 : i32 to vector<32x128xi32>
    %194 = arith.cmpi eq, %3, %193 : vector<32x128xi32>
    %195 = arith.extui %194 : vector<32x128xi1> to vector<32x128xi32>
    %196 = arith.sitofp %195 : vector<32x128xi32> to vector<32x128xf32>
    %cst_87 = arith.constant dense<0.000000e+00> : vector<128xf32>
    %197 = vector.multi_reduction <add>, %196, %cst_87 [0] : vector<32x128xf32> to vector<128xf32>
    %198 = vector.shape_cast %197 : vector<128xf32> to vector<1x128xf32>
    %c21 = arith.constant 21 : index
    %c0_88 = arith.constant 0 : index
    %199 = vector.load %arg2[%c21, %c0_88] : memref<22x128xf32, #tpu.memory_space<vmem>>, vector<1x128xf32>
    %200 = arith.addf %199, %198 : vector<1x128xf32>
    %c21_89 = arith.constant 21 : index
    %c0_90 = arith.constant 0 : index
    %201 = vector.load %arg2[%c21_89, %c0_90] : memref<22x128xf32, #tpu.memory_space<vmem>>, vector<1x128xf32>
    tpu.vector_store %arg2[%c21_89, %c0_90], %200 {strides = array<i32>} : memref<22x128xf32, #tpu.memory_space<vmem>>, vector<1x128xf32>,
    %c0_i32_91 = arith.constant 0 : i32
    %202 = arith.cmpi eq, %arg0, %c0_i32_91 : i32
    %203 = arith.extui %202 : i1 to i32
    %c0_i32_92 = arith.constant 0 : i32
    %204 = arith.cmpi ne, %203, %c0_i32_92 : i32
    scf.if %204 {
      %c0_93 = arith.constant 0 : index
      %c0_94 = arith.constant 0 : index
      %205 = vector.load %arg2[%c0_93, %c0_94] : memref<22x128xf32, #tpu.memory_space<vmem>>, vector<22x128xf32>
      %cst_95 = arith.constant 3.125000e-02 : f32
      %206 = vector.broadcast %cst_95 : f32 to vector<22x128xf32>
      %207 = arith.mulf %205, %206 : vector<22x128xf32>
      %c0_96 = arith.constant 0 : index
      %c0_97 = arith.constant 0 : index
      %208 = vector.load %arg2[%c0_96, %c0_97] : memref<22x128xf32, #tpu.memory_space<vmem>>, vector<22x128xf32>
      tpu.vector_store %arg2[%c0_96, %c0_97], %207 {strides = array<i32>} : memref<22x128xf32, #tpu.memory_space<vmem>>, vector<22x128xf32>,
    } else {
    }
    return
  }
  func.func @transform_0(%arg0: i32) -> (i32, i32) {
    %c0_i32 = arith.constant 0 : i32
    %c0_i32_0 = arith.constant 0 : i32
    return %arg0, %c0_i32 : i32, i32
  }
  func.func @transform_1(%arg0: i32) -> (i32, i32) {
    %c0_i32 = arith.constant 0 : i32
    %c0_i32_0 = arith.constant 0 : i32
    %c0_i32_1 = arith.constant 0 : i32
    return %c0_i32, %c0_i32_0 : i32, i32
  }
}

</mosaic_0001>

<bundles_post_ra>
// kernel: tpu_custom_call.1
= control target key start
LH: loop header
LB: loop body
LE: loop exit
PB: predicated region body
PF: predicated region fallthrough
CT: control target
= control target key end

     0   :  { %6 = vsyncpa [#allocation3], 0  ;;  %s956_s0 = inlined_call_operand.hbm [shape: s32[32,128], index: 0, kind: input, shape index: {}]   ;;  %s957_s1 = inlined_call_operand.hbm [shape: f32[22,128], index: 1, kind: output, shape index: {}]  }
   0x1   :  { %7 = vsyncpa [#allocation4], 0  ;;  %s12_s8 = sshll.u32 %s956_s0, 4  ;;  %s740_s9 = smov [#allocation2]   ;;  %s13_s8 = int_to_ptr.hbm [resolvable:$true] %s12_s8 }
   0x2   :  { %s14_s10 = sshll.u32 %s740_s9, 4  ;;  %s741_s11 = smov 128   ;;  %s15_s10 = int_to_ptr.vmem [resolvable:$true] %s14_s10 }
   0x3   :  { %s742_s12 = smov 8  }
   0x4   :  { %20 = dma.hbm_to_vmem [thread:$0]  %s13_s8, 512, %s15_s10, [#allocation3], %s741_s11, %s741_s11, %s742_s12  }
   0x5   :  { %736 = dma.done.wait [#allocation3], 512  }
   0x6   :  { %737 = vsyncadd [#allocation3], 4294966784  ;;  %v743_v0 = vmov 0.0   ;;  %v764_v1 = vld [vmem:[#allocation2] sm:$0xff]  ;;  %v766_v2 = vld [vmem:[#allocation2 + $0x8] sm:$0xff]  ;;  %s744_s0 = smov [#allocation5]  }
   0x7   :  { %29 = vst [vmem:[#allocation5] sm:$0xff] %v743_v0  ;;  %v768_v3 = vld [vmem:[#allocation2 + $0x10] sm:$0xff]  ;;  %v770_v4 = vld [vmem:[#allocation2 + $0x18] sm:$0xff]  ;;  %vm36_vm0 = vcmp.eq.s32.totalorder %v764_v1, 0  ;;  %vm37_vm1 = vcmp.eq.s32.totalorder %v766_v2, 0  ;;  %vm60_vm4 = vcmp.eq.s32.totalorder %v764_v1, 1 }
   0x8   :  { %30 = vst [vmem:[#allocation5 + $0x8] sm:$0xff] %v743_v0  ;;  %vm38_vm2 = vcmp.eq.s32.totalorder %v768_v3, 0  ;;  %vm39_vm3 = vcmp.eq.s32.totalorder %v770_v4, 0  ;;  %v595_v5 = vsel %vm36_vm0, 1.0, %v743_v0  ;;  %v596_v6 = vsel %vm37_vm1, 1.0, %v743_v0  ;;  %s580_s13 = sshll.u32 %s744_s0, 4  ;;  %s581_s13 = int_to_ptr.vmem [resolvable:$true] %s580_s13 }
   0x9   :  { %31 = vst [vmem:[#allocation5 + $0x10] sm:$0x3f] %v743_v0  ;;  %v597_v7 = vsel %vm38_vm2, 1.0, %v743_v0  ;;  %v598_v8 = vsel %vm39_vm3, 1.0, %v743_v0  ;;  %v48_v9 = vadd.f32 %v596_v6, %v595_v5  ;;  %vm61_vm5 = vcmp.eq.s32.totalorder %v766_v2, 1  ;;  %s582_s16 = sshll.u32 %s957_s1, 4  ;;  %s583_s16 = int_to_ptr.hbm [resolvable:$true] %s582_s16 }
   0xa   :  { %vm62_vm6 = vcmp.eq.s32.totalorder %v768_v3, 1  ;;  %vm63_vm7 = vcmp.eq.s32.totalorder %v770_v4, 1  ;;  %v599_v10 = vsel %vm60_vm4, 1.0, %v743_v0  ;;  %v600_v11 = vsel %vm61_vm5, 1.0, %v743_v0 }
   0xb   :  { %v49_v12 = vadd.f32 %v597_v7, %v48_v9  ;;  %v601_v13 = vsel %vm62_vm6, 1.0, %v743_v0  ;;  %v602_v14 = vsel %vm63_vm7, 1.0, %v743_v0  ;;  %v72_v15 = vadd.f32 %v600_v11, %v599_v10 }
   0xc   :  { %vm84_vm8 = vcmp.eq.s32.totalorder %v764_v1, 2  ;;  %vm85_vm9 = vcmp.eq.s32.totalorder %v766_v2, 2  ;;  %vm86_vm10 = vcmp.eq.s32.totalorder %v768_v3, 2  ;;  %vm87_vm11 = vcmp.eq.s32.totalorder %v770_v4, 2 }
   0xd   :  { %v50_v16 = vadd.f32 %v598_v8, %v49_v12  ;;  %v73_v17 = vadd.f32 %v601_v13, %v72_v15  ;;  %v603_v18 = vsel %vm84_vm8, 1.0, %v743_v0  ;;  %v604_v19 = vsel %vm85_vm9, 1.0, %v743_v0 }
   0xe   :  { %v605_v20 = vsel %vm86_vm10, 1.0, %v743_v0  ;;  %v606_v21 = vsel %vm87_vm11, 1.0, %v743_v0  ;;  %v96_v22 = vadd.f32 %v604_v19, %v603_v18  ;;  %vm108_vm12 = vcmp.eq.s32.totalorder %v764_v1, 3  ;;  %v57_v49 = vld [vmem:[#allocation5] sm:$0x1] }
   0xf   :  { %v51_v23 = vrot.slane %v50_v16, 4  ;;  %v74_v24 = vadd.f32 %v602_v14, %v73_v17  ;;  %vm109_vm13 = vcmp.eq.s32.totalorder %v766_v2, 3  ;;  %vm110_vm14 = vcmp.eq.s32.totalorder %v768_v3, 3  ;;  %v81_v57 = vld [vmem:[#allocation5 + $0x1] sm:$0x1] }
  0x10   :  { %v97_v25 = vadd.f32 %v605_v20, %v96_v22  ;;  %vm111_vm15 = vcmp.eq.s32.totalorder %v770_v4, 3  ;;  %v607_v26 = vsel %vm108_vm12, 1.0, %v743_v0  ;;  %v608_v27 = vsel %vm109_vm13, 1.0, %v743_v0  ;;  %v105_v11 = vld [vmem:[#allocation5 + $0x2] sm:$0x1] }
  0x11   :  { %v52_v28 = vadd.f32 %v51_v23, %v50_v16  ;;  %v75_v29 = vrot.slane %v74_v24, 4  ;;  %v609_v30 = vsel %vm110_vm14, 1.0, %v743_v0  ;;  %v610_v31 = vsel %vm111_vm15, 1.0, %v743_v0 }
  0x12   :  { %v98_v32 = vadd.f32 %v606_v21, %v97_v25  ;;  %v120_v33 = vadd.f32 %v608_v27, %v607_v26  ;;  %vm132_vm0 = vcmp.eq.s32.totalorder %v764_v1, 4  ;;  %vm133_vm1 = vcmp.eq.s32.totalorder %v766_v2, 4 }
  0x13   :  { %v53_v34 = vrot.slane %v52_v28, 2  ;;  %v76_v35 = vadd.f32 %v75_v29, %v74_v24  ;;  %vm134_vm2 = vcmp.eq.s32.totalorder %v768_v3, 4  ;;  %vm135_vm3 = vcmp.eq.s32.totalorder %v770_v4, 4  ;;  %v129_v24 = vld [vmem:[#allocation5 + $0x3] sm:$0x1] }
  0x14   :  { %v99_v36 = vrot.slane %v98_v32, 4  ;;  %v121_v37 = vadd.f32 %v609_v30, %v120_v33  ;;  %v611_v38 = vsel %vm132_vm0, 1.0, %v743_v0  ;;  %v612_v39 = vsel %vm133_vm1, 1.0, %v743_v0 }
  0x15   :  { %v54_v40 = vadd.f32 %v53_v34, %v52_v28  ;;  %v77_v41 = vrot.slane %v76_v35, 2  ;;  %v613_v42 = vsel %vm134_vm2, 1.0, %v743_v0  ;;  %v614_v43 = vsel %vm135_vm3, 1.0, %v743_v0 }
  0x16   :  { %v100_v44 = vadd.f32 %v99_v36, %v98_v32  ;;  %v122_v45 = vadd.f32 %v610_v31, %v121_v37  ;;  %v144_v46 = vadd.f32 %v612_v39, %v611_v38  ;;  %vm156_vm4 = vcmp.eq.s32.totalorder %v764_v1, 5  ;;  %v153_v37 = vld [vmem:[#allocation5 + $0x4] sm:$0x1] }
  0x17   :  { %v55_v47 = vrot.slane %v54_v40, 1  ;;  %v78_v48 = vadd.f32 %v77_v41, %v76_v35  ;;  %vm157_vm5 = vcmp.eq.s32.totalorder %v766_v2, 5  ;;  %vm158_vm6 = vcmp.eq.s32.totalorder %v768_v3, 5 }
  0x18   :  { %v101_v50 = vrot.slane %v100_v44, 2  ;;  %v123_v51 = vrot.slane %v122_v45, 4  ;;  %v145_v52 = vadd.f32 %v613_v42, %v144_v46  ;;  %vm159_vm7 = vcmp.eq.s32.totalorder %v770_v4, 5 }
  0x19   :  { %v56_v53 = vadd.f32 %v55_v47, %v54_v40  ;;  %v79_v54 = vrot.slane %v78_v48, 1  ;;  %v615_v55 = vsel %vm156_vm4, 1.0, %v743_v0  ;;  %v616_v56 = vsel %vm157_vm5, 1.0, %v743_v0 }
  0x1a   :  { %v102_v58 = vadd.f32 %v101_v50, %v100_v44  ;;  %v124_v59 = vadd.f32 %v123_v51, %v122_v45  ;;  %v146_v60 = vadd.f32 %v614_v43, %v145_v52  ;;  %v617_v61 = vsel %vm158_vm6, 1.0, %v743_v0  ;;  %v177_v51 = vld [vmem:[#allocation5 + $0x5] sm:$0x1] }
  0x1b   :  { %v58_v62 = vadd.f32 %v57_v49, %v56_v53  ;;  %v80_v63 = vadd.f32 %v79_v54, %v78_v48  ;;  %v618_v5 = vsel %vm159_vm7, 1.0, %v743_v0  ;;  %v168_v6 = vadd.f32 %v616_v56, %v615_v55 }
  0x1c   :  { %v103_v7 = vrot.slane %v102_v58, 1  ;;  %v125_v8 = vrot.slane %v124_v59, 2  ;;  %v147_v9 = vrot.slane %v146_v60, 4  ;;  %vm180_vm8 = vcmp.eq.s32.totalorder %v764_v1, 6 }
  0x1d   :  { %59 = vst [vmem:[#allocation5] sm:$0x1] %v58_v62  ;;  %v82_v10 = vadd.f32 %v81_v57, %v80_v63  ;;  %v169_v12 = vadd.f32 %v617_v61, %v168_v6  ;;  %vm181_vm9 = vcmp.eq.s32.totalorder %v766_v2, 6  ;;  %vm182_vm10 = vcmp.eq.s32.totalorder %v768_v3, 6 }
  0x1e   :  { %v104_v13 = vadd.f32 %v103_v7, %v102_v58  ;;  %v126_v14 = vadd.f32 %v125_v8, %v124_v59  ;;  %v148_v15 = vadd.f32 %v147_v9, %v146_v60  ;;  %vm183_vm11 = vcmp.eq.s32.totalorder %v770_v4, 6 }
  0x1f   :  { %83 = vst [vmem:[#allocation5 + $0x1] sm:$0x1] %v82_v10  ;;  %v170_v16 = vadd.f32 %v618_v5, %v169_v12  ;;  %v619_v17 = vsel %vm180_vm8, 1.0, %v743_v0  ;;  %v620_v18 = vsel %vm181_vm9, 1.0, %v743_v0  ;;  %v621_v19 = vsel %vm182_vm10, 1.0, %v743_v0 }
  0x20   :  { %v106_v20 = vadd.f32 %v105_v11, %v104_v13  ;;  %v127_v21 = vrot.slane %v126_v14, 1  ;;  %v149_v22 = vrot.slane %v148_v15, 2  ;;  %v622_v23 = vsel %vm183_vm11, 1.0, %v743_v0  ;;  %v201_v12 = vld [vmem:[#allocation5 + $0x6] sm:$0x1] }
  0x21   :  { %v171_v25 = vrot.slane %v170_v16, 4  ;;  %v192_v26 = vadd.f32 %v620_v18, %v619_v17  ;;  %vm204_vm12 = vcmp.eq.s32.totalorder %v764_v1, 7  ;;  %vm205_vm13 = vcmp.eq.s32.totalorder %v766_v2, 7 }
  0x22   :  { %107 = vst [vmem:[#allocation5 + $0x2] sm:$0x1] %v106_v20  ;;  %v128_v27 = vadd.f32 %v127_v21, %v126_v14  ;;  %v150_v28 = vadd.f32 %v149_v22, %v148_v15  ;;  %vm206_vm14 = vcmp.eq.s32.totalorder %v768_v3, 7  ;;  %vm207_vm15 = vcmp.eq.s32.totalorder %v770_v4, 7 }
  0x23   :  { %v172_v29 = vadd.f32 %v171_v25, %v170_v16  ;;  %v193_v30 = vadd.f32 %v621_v19, %v192_v26  ;;  %v623_v31 = vsel %vm204_vm12, 1.0, %v743_v0  ;;  %v624_v32 = vsel %vm205_vm13, 1.0, %v743_v0  ;;  %v225_v26 = vld [vmem:[#allocation5 + $0x7] sm:$0x1] }
  0x24   :  { %v130_v33 = vadd.f32 %v129_v24, %v128_v27  ;;  %v151_v34 = vrot.slane %v150_v28, 1  ;;  %v625_v35 = vsel %vm206_vm14, 1.0, %v743_v0  ;;  %v626_v36 = vsel %vm207_vm15, 1.0, %v743_v0 }
  0x25   :  { %v173_v38 = vrot.slane %v172_v29, 2  ;;  %v194_v39 = vadd.f32 %v622_v23, %v193_v30  ;;  %v216_v40 = vadd.f32 %v624_v32, %v623_v31  ;;  %vm228_vm0 = vcmp.eq.s32.totalorder %v764_v1, 8 }
  0x26   :  { %131 = vst [vmem:[#allocation5 + $0x3] sm:$0x1] %v130_v33  ;;  %v152_v41 = vadd.f32 %v151_v34, %v150_v28  ;;  %vm229_vm1 = vcmp.eq.s32.totalorder %v766_v2, 8  ;;  %vm230_vm2 = vcmp.eq.s32.totalorder %v768_v3, 8  ;;  %vm231_vm3 = vcmp.eq.s32.totalorder %v770_v4, 8 }
  0x27   :  { %v174_v42 = vadd.f32 %v173_v38, %v172_v29  ;;  %v195_v43 = vrot.slane %v194_v39, 4  ;;  %v217_v44 = vadd.f32 %v625_v35, %v216_v40  ;;  %v627_v45 = vsel %vm228_vm0, 1.0, %v743_v0  ;;  %v249_v40 = vld [vmem:[#allocation5 + $0x8] sm:$0x1] }
  0x28   :  { %v154_v46 = vadd.f32 %v153_v37, %v152_v41  ;;  %v628_v47 = vsel %vm229_vm1, 1.0, %v743_v0  ;;  %v629_v48 = vsel %vm230_vm2, 1.0, %v743_v0  ;;  %v630_v49 = vsel %vm231_vm3, 1.0, %v743_v0 }
  0x29   :  { %v175_v50 = vrot.slane %v174_v42, 1  ;;  %v196_v52 = vadd.f32 %v195_v43, %v194_v39  ;;  %v218_v53 = vadd.f32 %v626_v36, %v217_v44  ;;  %v240_v54 = vadd.f32 %v628_v47, %v627_v45 }
  0x2a   :  { %155 = vst [vmem:[#allocation5 + $0x4] sm:$0x1] %v154_v46  ;;  %vm252_vm4 = vcmp.eq.s32.totalorder %v764_v1, 9  ;;  %vm253_vm5 = vcmp.eq.s32.totalorder %v766_v2, 9  ;;  %vm254_vm6 = vcmp.eq.s32.totalorder %v768_v3, 9  ;;  %vm255_vm7 = vcmp.eq.s32.totalorder %v770_v4, 9 }
  0x2b   :  { %v176_v55 = vadd.f32 %v175_v50, %v174_v42  ;;  %v197_v56 = vrot.slane %v196_v52, 2  ;;  %v219_v57 = vrot.slane %v218_v53, 4  ;;  %v241_v58 = vadd.f32 %v629_v48, %v240_v54 }
  0x2c   :  { %v631_v59 = vsel %vm252_vm4, 1.0, %v743_v0  ;;  %v632_v60 = vsel %vm253_vm5, 1.0, %v743_v0  ;;  %v633_v61 = vsel %vm254_vm6, 1.0, %v743_v0  ;;  %v634_v62 = vsel %vm255_vm7, 1.0, %v743_v0 }
  0x2d   :  { %v178_v63 = vadd.f32 %v177_v51, %v176_v55  ;;  %v198_v5 = vadd.f32 %v197_v56, %v196_v52  ;;  %v220_v6 = vadd.f32 %v219_v57, %v218_v53  ;;  %v242_v7 = vadd.f32 %v630_v49, %v241_v58  ;;  %v273_v55 = vld [vmem:[#allocation5 + $0x9] sm:$0x1] }
  0x2e   :  { %v264_v8 = vadd.f32 %v632_v60, %v631_v59  ;;  %vm276_vm8 = vcmp.eq.s32.totalorder %v764_v1, 10  ;;  %vm277_vm9 = vcmp.eq.s32.totalorder %v766_v2, 10  ;;  %vm278_vm10 = vcmp.eq.s32.totalorder %v768_v3, 10 }
  0x2f   :  { %179 = vst [vmem:[#allocation5 + $0x5] sm:$0x1] %v178_v63  ;;  %v199_v9 = vrot.slane %v198_v5, 1  ;;  %v221_v10 = vrot.slane %v220_v6, 2  ;;  %v243_v11 = vrot.slane %v242_v7, 4  ;;  %vm279_vm11 = vcmp.eq.s32.totalorder %v770_v4, 10 }
  0x30   :  { %v265_v13 = vadd.f32 %v633_v61, %v264_v8  ;;  %v635_v14 = vsel %vm276_vm8, 1.0, %v743_v0  ;;  %v636_v15 = vsel %vm277_vm9, 1.0, %v743_v0  ;;  %v637_v16 = vsel %vm278_vm10, 1.0, %v743_v0 }
  0x31   :  { %v200_v17 = vadd.f32 %v199_v9, %v198_v5  ;;  %v222_v18 = vadd.f32 %v221_v10, %v220_v6  ;;  %v244_v19 = vadd.f32 %v243_v11, %v242_v7  ;;  %v638_v20 = vsel %vm279_vm11, 1.0, %v743_v0 }
  0x32   :  { %v266_v21 = vadd.f32 %v634_v62, %v265_v13  ;;  %v288_v22 = vadd.f32 %v636_v15, %v635_v14  ;;  %vm300_vm12 = vcmp.eq.s32.totalorder %v764_v1, 11  ;;  %vm301_vm13 = vcmp.eq.s32.totalorder %v766_v2, 11  ;;  %v297_v14 = vld [vmem:[#allocation5 + $0xa] sm:$0x1] }
  0x33   :  { %v202_v23 = vadd.f32 %v201_v12, %v200_v17  ;;  %v223_v24 = vrot.slane %v222_v18, 1  ;;  %v245_v25 = vrot.slane %v244_v19, 2  ;;  %vm302_vm14 = vcmp.eq.s32.totalorder %v768_v3, 11 }
  0x34   :  { %v267_v27 = vrot.slane %v266_v21, 4  ;;  %v289_v28 = vadd.f32 %v637_v16, %v288_v22  ;;  %vm303_vm15 = vcmp.eq.s32.totalorder %v770_v4, 11  ;;  %v639_v29 = vsel %vm300_vm12, 1.0, %v743_v0 }
  0x35   :  { %203 = vst [vmem:[#allocation5 + $0x6] sm:$0x1] %v202_v23  ;;  %v224_v30 = vadd.f32 %v223_v24, %v222_v18  ;;  %v246_v31 = vadd.f32 %v245_v25, %v244_v19  ;;  %v640_v32 = vsel %vm301_vm13, 1.0, %v743_v0  ;;  %v641_v33 = vsel %vm302_vm14, 1.0, %v743_v0 }
  0x36   :  { %v268_v34 = vadd.f32 %v267_v27, %v266_v21  ;;  %v290_v35 = vadd.f32 %v638_v20, %v289_v28  ;;  %v642_v36 = vsel %vm303_vm15, 1.0, %v743_v0  ;;  %v312_v37 = vadd.f32 %v640_v32, %v639_v29  ;;  %v321_v27 = vld [vmem:[#allocation5 + $0xb] sm:$0x1] }
  0x37   :  { %v226_v38 = vadd.f32 %v225_v26, %v224_v30  ;;  %v247_v39 = vrot.slane %v246_v31, 1  ;;  %vm324_vm0 = vcmp.eq.s32.totalorder %v764_v1, 12  ;;  %vm325_vm1 = vcmp.eq.s32.totalorder %v766_v2, 12 }
  0x38   :  { %v269_v41 = vrot.slane %v268_v34, 2  ;;  %v291_v42 = vrot.slane %v290_v35, 4  ;;  %v313_v43 = vadd.f32 %v641_v33, %v312_v37  ;;  %vm326_vm2 = vcmp.eq.s32.totalorder %v768_v3, 12 }
  0x39   :  { %227 = vst [vmem:[#allocation5 + $0x7] sm:$0x1] %v226_v38  ;;  %v248_v44 = vadd.f32 %v247_v39, %v246_v31  ;;  %vm327_vm3 = vcmp.eq.s32.totalorder %v770_v4, 12  ;;  %v643_v45 = vsel %vm324_vm0, 1.0, %v743_v0  ;;  %v644_v46 = vsel %vm325_vm1, 1.0, %v743_v0 }
  0x3a   :  { %v270_v47 = vadd.f32 %v269_v41, %v268_v34  ;;  %v292_v48 = vadd.f32 %v291_v42, %v290_v35  ;;  %v314_v49 = vadd.f32 %v642_v36, %v313_v43  ;;  %v645_v50 = vsel %vm326_vm2, 1.0, %v743_v0  ;;  %v345_v41 = vld [vmem:[#allocation5 + $0xc] sm:$0x1] }
  0x3b   :  { %v250_v51 = vadd.f32 %v249_v40, %v248_v44  ;;  %v646_v52 = vsel %vm327_vm3, 1.0, %v743_v0  ;;  %v336_v53 = vadd.f32 %v644_v46, %v643_v45  ;;  %vm348_vm4 = vcmp.eq.s32.totalorder %v764_v1, 13 }
  0x3c   :  { %v271_v54 = vrot.slane %v270_v47, 1  ;;  %v293_v56 = vrot.slane %v292_v48, 2  ;;  %v315_v57 = vrot.slane %v314_v49, 4  ;;  %vm349_vm5 = vcmp.eq.s32.totalorder %v766_v2, 13 }
  0x3d   :  { %251 = vst [vmem:[#allocation5 + $0x8] sm:$0x1] %v250_v51  ;;  %v337_v58 = vadd.f32 %v645_v50, %v336_v53  ;;  %vm350_vm6 = vcmp.eq.s32.totalorder %v768_v3, 13  ;;  %vm351_vm7 = vcmp.eq.s32.totalorder %v770_v4, 13  ;;  %v647_v59 = vsel %vm348_vm4, 1.0, %v743_v0 }
  0x3e   :  { %v272_v60 = vadd.f32 %v271_v54, %v270_v47  ;;  %v294_v61 = vadd.f32 %v293_v56, %v292_v48  ;;  %v316_v62 = vadd.f32 %v315_v57, %v314_v49  ;;  %v648_v63 = vsel %vm349_vm5, 1.0, %v743_v0  ;;  %v369_v57 = vld [vmem:[#allocation5 + $0xd] sm:$0x1] }
  0x3f   :  { %v338_v5 = vadd.f32 %v646_v52, %v337_v58  ;;  %v649_v6 = vsel %vm350_vm6, 1.0, %v743_v0  ;;  %v650_v7 = vsel %vm351_vm7, 1.0, %v743_v0  ;;  %v360_v8 = vadd.f32 %v648_v63, %v647_v59 }
  0x40   :  { %v567_v9 = vld [vmem:[#allocation5] sm:$0xff]  ;;  %v274_v10 = vadd.f32 %v273_v55, %v272_v60  ;;  %v295_v11 = vrot.slane %v294_v61, 1  ;;  %v317_v12 = vrot.slane %v316_v62, 2  ;;  %vm372_vm8 = vcmp.eq.s32.totalorder %v764_v1, 14 }
  0x41   :  { %v570_v13 = vmul.f32 0.03125, %v567_v9  ;;  %v339_v15 = vrot.slane %v338_v5, 4  ;;  %v361_v16 = vadd.f32 %v649_v6, %v360_v8  ;;  %vm373_vm9 = vcmp.eq.s32.totalorder %v766_v2, 14 }
  0x42   :  { %275 = vst [vmem:[#allocation5 + $0x9] sm:$0x1] %v274_v10  ;;  %v296_v17 = vadd.f32 %v295_v11, %v294_v61  ;;  %v318_v18 = vadd.f32 %v317_v12, %v316_v62  ;;  %vm374_vm10 = vcmp.eq.s32.totalorder %v768_v3, 14  ;;  %vm375_vm11 = vcmp.eq.s32.totalorder %v770_v4, 14 }
  0x43   :  { %573 = vst [vmem:[#allocation5] sm:$0xff] %v570_v13  ;;  %v340_v19 = vadd.f32 %v339_v15, %v338_v5  ;;  %v362_v20 = vadd.f32 %v650_v7, %v361_v16  ;;  %v651_v21 = vsel %vm372_vm8, 1.0, %v743_v0  ;;  %v652_v22 = vsel %vm373_vm9, 1.0, %v743_v0  ;;  %v393_v15 = vld [vmem:[#allocation5 + $0xe] sm:$0x1] }
  0x44   :  { %v298_v23 = vadd.f32 %v297_v14, %v296_v17  ;;  %v319_v24 = vrot.slane %v318_v18, 1  ;;  %v653_v25 = vsel %vm374_vm10, 1.0, %v743_v0  ;;  %v654_v26 = vsel %vm375_vm11, 1.0, %v743_v0 }
  0x45   :  { %v341_v28 = vrot.slane %v340_v19, 2  ;;  %v363_v29 = vrot.slane %v362_v20, 4  ;;  %v384_v30 = vadd.f32 %v652_v22, %v651_v21  ;;  %vm396_vm12 = vcmp.eq.s32.totalorder %v764_v1, 15 }
  0x46   :  { %299 = vst [vmem:[#allocation5 + $0xa] sm:$0x1] %v298_v23  ;;  %v320_v31 = vadd.f32 %v319_v24, %v318_v18  ;;  %vm397_vm13 = vcmp.eq.s32.totalorder %v766_v2, 15  ;;  %vm398_vm14 = vcmp.eq.s32.totalorder %v768_v3, 15  ;;  %vm399_vm15 = vcmp.eq.s32.totalorder %v770_v4, 15 }
  0x47   :  { %v342_v32 = vadd.f32 %v341_v28, %v340_v19  ;;  %v364_v33 = vadd.f32 %v363_v29, %v362_v20  ;;  %v385_v34 = vadd.f32 %v653_v25, %v384_v30  ;;  %v655_v35 = vsel %vm396_vm12, 1.0, %v743_v0  ;;  %v417_v29 = vld [vmem:[#allocation5 + $0xf] sm:$0x1] }
  0x48   :  { %v322_v36 = vadd.f32 %v321_v27, %v320_v31  ;;  %v656_v37 = vsel %vm397_vm13, 1.0, %v743_v0  ;;  %v657_v38 = vsel %vm398_vm14, 1.0, %v743_v0  ;;  %v658_v39 = vsel %vm399_vm15, 1.0, %v743_v0 }
  0x49   :  { %v343_v40 = vrot.slane %v342_v32, 1  ;;  %v365_v42 = vrot.slane %v364_v33, 2  ;;  %v386_v43 = vadd.f32 %v654_v26, %v385_v34  ;;  %v408_v44 = vadd.f32 %v656_v37, %v655_v35 }
  0x4a   :  { %323 = vst [vmem:[#allocation5 + $0xb] sm:$0x1] %v322_v36  ;;  %vm420_vm0 = vcmp.eq.s32.totalorder %v764_v1, 16  ;;  %vm421_vm1 = vcmp.eq.s32.totalorder %v766_v2, 16  ;;  %vm422_vm2 = vcmp.eq.s32.totalorder %v768_v3, 16  ;;  %vm423_vm3 = vcmp.eq.s32.totalorder %v770_v4, 16 }
  0x4b   :  { %v344_v45 = vadd.f32 %v343_v40, %v342_v32  ;;  %v366_v46 = vadd.f32 %v365_v42, %v364_v33  ;;  %v387_v47 = vrot.slane %v386_v43, 4  ;;  %v409_v48 = vadd.f32 %v657_v38, %v408_v44  ;;  %v441_v44 = vld [vmem:[#allocation5 + $0x10] sm:$0x1] }
  0x4c   :  { %v659_v49 = vsel %vm420_vm0, 1.0, %v743_v0  ;;  %v660_v50 = vsel %vm421_vm1, 1.0, %v743_v0  ;;  %v661_v51 = vsel %vm422_vm2, 1.0, %v743_v0  ;;  %v662_v52 = vsel %vm423_vm3, 1.0, %v743_v0 }
  0x4d   :  { %v346_v53 = vadd.f32 %v345_v41, %v344_v45  ;;  %v367_v54 = vrot.slane %v366_v46, 1  ;;  %v388_v55 = vadd.f32 %v387_v47, %v386_v43  ;;  %v410_v56 = vadd.f32 %v658_v39, %v409_v48 }
  0x4e   :  { %v432_v58 = vadd.f32 %v660_v50, %v659_v49  ;;  %vm444_vm4 = vcmp.eq.s32.totalorder %v764_v1, 17  ;;  %vm445_vm5 = vcmp.eq.s32.totalorder %v766_v2, 17  ;;  %vm446_vm6 = vcmp.eq.s32.totalorder %v768_v3, 17 }
  0x4f   :  { %347 = vst [vmem:[#allocation5 + $0xc] sm:$0x1] %v346_v53  ;;  %v368_v59 = vadd.f32 %v367_v54, %v366_v46  ;;  %v389_v60 = vrot.slane %v388_v55, 2  ;;  %v411_v61 = vrot.slane %v410_v56, 4  ;;  %vm447_vm7 = vcmp.eq.s32.totalorder %v770_v4, 17 }
  0x50   :  { %v433_v62 = vadd.f32 %v661_v51, %v432_v58  ;;  %v663_v63 = vsel %vm444_vm4, 1.0, %v743_v0  ;;  %v664_v5 = vsel %vm445_vm5, 1.0, %v743_v0  ;;  %v665_v6 = vsel %vm446_vm6, 1.0, %v743_v0 }
  0x51   :  { %v370_v7 = vadd.f32 %v369_v57, %v368_v59  ;;  %v390_v8 = vadd.f32 %v389_v60, %v388_v55  ;;  %v412_v9 = vadd.f32 %v411_v61, %v410_v56  ;;  %v666_v10 = vsel %vm447_vm7, 1.0, %v743_v0  ;;  %v465_v60 = vld [vmem:[#allocation5 + $0x11] sm:$0x1] }
  0x52   :  { %v434_v11 = vadd.f32 %v662_v52, %v433_v62  ;;  %v456_v12 = vadd.f32 %v664_v5, %v663_v63  ;;  %vm468_vm8 = vcmp.eq.s32.totalorder %v764_v1, 18  ;;  %vm469_vm9 = vcmp.eq.s32.totalorder %v766_v2, 18 }
  0x53   :  { %371 = vst [vmem:[#allocation5 + $0xd] sm:$0x1] %v370_v7  ;;  %v391_v13 = vrot.slane %v390_v8, 1  ;;  %v413_v14 = vrot.slane %v412_v9, 2  ;;  %vm470_vm10 = vcmp.eq.s32.totalorder %v768_v3, 18  ;;  %vm471_vm11 = vcmp.eq.s32.totalorder %v770_v4, 18 }
  0x54   :  { %v435_v16 = vrot.slane %v434_v11, 4  ;;  %v457_v17 = vadd.f32 %v665_v6, %v456_v12  ;;  %v667_v18 = vsel %vm468_vm8, 1.0, %v743_v0  ;;  %v668_v19 = vsel %vm469_vm9, 1.0, %v743_v0 }
  0x55   :  { %v392_v20 = vadd.f32 %v391_v13, %v390_v8  ;;  %v414_v21 = vadd.f32 %v413_v14, %v412_v9  ;;  %v669_v22 = vsel %vm470_vm10, 1.0, %v743_v0  ;;  %v670_v23 = vsel %vm471_vm11, 1.0, %v743_v0  ;;  %v489_v14 = vld [vmem:[#allocation5 + $0x12] sm:$0x1] }
  0x56   :  { %v436_v24 = vadd.f32 %v435_v16, %v434_v11  ;;  %v458_v25 = vadd.f32 %v666_v10, %v457_v17  ;;  %v480_v26 = vadd.f32 %v668_v19, %v667_v18  ;;  %vm492_vm12 = vcmp.eq.s32.totalorder %v764_v1, 19 }
  0x57   :  { %v394_v27 = vadd.f32 %v393_v15, %v392_v20  ;;  %v415_v28 = vrot.slane %v414_v21, 1  ;;  %vm493_vm13 = vcmp.eq.s32.totalorder %v766_v2, 19  ;;  %vm494_vm14 = vcmp.eq.s32.totalorder %v768_v3, 19 }
  0x58   :  { %v437_v30 = vrot.slane %v436_v24, 2  ;;  %v459_v31 = vrot.slane %v458_v25, 4  ;;  %v481_v32 = vadd.f32 %v669_v22, %v480_v26  ;;  %vm495_vm15 = vcmp.eq.s32.totalorder %v770_v4, 19 }
  0x59   :  { %395 = vst [vmem:[#allocation5 + $0xe] sm:$0x1] %v394_v27  ;;  %v416_v33 = vadd.f32 %v415_v28, %v414_v21  ;;  %v671_v34 = vsel %vm492_vm12, 1.0, %v743_v0  ;;  %v672_v35 = vsel %vm493_vm13, 1.0, %v743_v0  ;;  %v673_v36 = vsel %vm494_vm14, 1.0, %v743_v0 }
  0x5a   :  { %v438_v37 = vadd.f32 %v437_v30, %v436_v24  ;;  %v460_v38 = vadd.f32 %v459_v31, %v458_v25  ;;  %v482_v39 = vadd.f32 %v670_v23, %v481_v32  ;;  %v674_v40 = vsel %vm495_vm15, 1.0, %v743_v0  ;;  %v513_v25 = vld [vmem:[#allocation5 + $0x13] sm:$0x1] }
  0x5b   :  { %v418_v41 = vadd.f32 %v417_v29, %v416_v33  ;;  %v504_v42 = vadd.f32 %v672_v35, %v671_v34  ;;  %vm516_vm0 = vcmp.eq.s32.totalorder %v764_v1, 20  ;;  %vm517_vm1 = vcmp.eq.s32.totalorder %v766_v2, 20 }
  0x5c   :  { %v439_v43 = vrot.slane %v438_v37, 1  ;;  %v461_v45 = vrot.slane %v460_v38, 2  ;;  %v483_v46 = vrot.slane %v482_v39, 4  ;;  %vm518_vm2 = vcmp.eq.s32.totalorder %v768_v3, 20 }
  0x5d   :  { %419 = vst [vmem:[#allocation5 + $0xf] sm:$0x1] %v418_v41  ;;  %v505_v47 = vadd.f32 %v673_v36, %v504_v42  ;;  %vm519_vm3 = vcmp.eq.s32.totalorder %v770_v4, 20  ;;  %v675_v48 = vsel %vm516_vm0, 1.0, %v743_v0  ;;  %v676_v49 = vsel %vm517_vm1, 1.0, %v743_v0 }
  0x5e   :  { %v440_v50 = vadd.f32 %v439_v43, %v438_v37  ;;  %v462_v51 = vadd.f32 %v461_v45, %v460_v38  ;;  %v484_v52 = vadd.f32 %v483_v46, %v482_v39  ;;  %v677_v53 = vsel %vm518_vm2, 1.0, %v743_v0  ;;  %v561_v36 = vld [vmem:[#allocation5 + $0x15] sm:$0x1] }
  0x5f   :  { %v506_v54 = vadd.f32 %v674_v40, %v505_v47  ;;  %v678_v55 = vsel %vm519_vm3, 1.0, %v743_v0  ;;  %v528_v56 = vadd.f32 %v676_v49, %v675_v48  ;;  %vm540_vm4 = vcmp.eq.s32.totalorder %v764_v1, 21 }
  0x60   :  { %v442_v57 = vadd.f32 %v441_v44, %v440_v50  ;;  %v463_v58 = vrot.slane %v462_v51, 1  ;;  %v485_v59 = vrot.slane %v484_v52, 2  ;;  %vm541_vm5 = vcmp.eq.s32.totalorder %v766_v2, 21 }
  0x61   :  { %v507_v61 = vrot.slane %v506_v54, 4  ;;  %v529_v62 = vadd.f32 %v677_v53, %v528_v56  ;;  %vm542_vm6 = vcmp.eq.s32.totalorder %v768_v3, 21  ;;  %vm543_vm7 = vcmp.eq.s32.totalorder %v770_v4, 21  ;;  %v537_v4 = vld [vmem:[#allocation5 + $0x14] sm:$0x1] }
  0x62   :  { %443 = vst [vmem:[#allocation5 + $0x10] sm:$0x1] %v442_v57  ;;  %v464_v63 = vadd.f32 %v463_v58, %v462_v51  ;;  %v486_v5 = vadd.f32 %v485_v59, %v484_v52  ;;  %v679_v6 = vsel %vm540_vm4, 1.0, %v743_v0  ;;  %v680_v7 = vsel %vm541_vm5, 1.0, %v743_v0 }
  0x63   :  { %v508_v1 = vadd.f32 %v507_v61, %v506_v54  ;;  %v530_v8 = vadd.f32 %v678_v55, %v529_v62  ;;  %v681_v9 = vsel %vm542_vm6, 1.0, %v743_v0  ;;  %v552_v12 = vadd.f32 %v680_v7, %v679_v6 }
  0x64   :  { %v568_v10 = vld [vmem:[#allocation5 + $0x8] sm:$0xff]  ;;  %v466_v2 = vadd.f32 %v465_v60, %v464_v63  ;;  %v487_v11 = vrot.slane %v486_v5, 1  ;;  %v682_v16 = vsel %vm543_vm7, 1.0, %v743_v0 }
  0x65   :  { %v571_v13 = vmul.f32 0.03125, %v568_v10  ;;  %v509_v3 = vrot.slane %v508_v1, 2  ;;  %v531_v15 = vrot.slane %v530_v8, 4  ;;  %v553_v18 = vadd.f32 %v681_v9, %v552_v12 }
  0x66   :  { %467 = vst [vmem:[#allocation5 + $0x11] sm:$0x1] %v466_v2  ;;  %v488_v17 = vadd.f32 %v487_v11, %v486_v5 }
  0x67   :  { %574 = vst [vmem:[#allocation5 + $0x8] sm:$0xff] %v571_v13  ;;  %v510_v19 = vadd.f32 %v509_v3, %v508_v1  ;;  %v532_v20 = vadd.f32 %v531_v15, %v530_v8  ;;  %v554_v22 = vadd.f32 %v682_v16, %v553_v18 }
  0x68   :  { %v490_v21 = vadd.f32 %v489_v14, %v488_v17 }
  0x69   :  { %v511_v23 = vrot.slane %v510_v19, 1  ;;  %v533_v24 = vrot.slane %v532_v20, 2  ;;  %v555_v26 = vrot.slane %v554_v22, 4 }
  0x6a   :  { %491 = vst [vmem:[#allocation5 + $0x12] sm:$0x1] %v490_v21 }
  0x6b   :  { %v512_v27 = vadd.f32 %v511_v23, %v510_v19  ;;  %v534_v28 = vadd.f32 %v533_v24, %v532_v20  ;;  %v556_v29 = vadd.f32 %v555_v26, %v554_v22 }
  0x6d   :  { %v514_v30 = vadd.f32 %v513_v25, %v512_v27  ;;  %v535_v31 = vrot.slane %v534_v28, 1  ;;  %v557_v0 = vrot.slane %v556_v29, 2 }
  0x6f   :  { %515 = vst [vmem:[#allocation5 + $0x13] sm:$0x1] %v514_v30  ;;  %v536_v32 = vadd.f32 %v535_v31, %v534_v28  ;;  %v558_v33 = vadd.f32 %v557_v0, %v556_v29 }
  0x71   :  { %v538_v34 = vadd.f32 %v537_v4, %v536_v32  ;;  %v559_v35 = vrot.slane %v558_v33, 1 }
  0x73   :  { %539 = vst [vmem:[#allocation5 + $0x14] sm:$0x1] %v538_v34  ;;  %v560_v37 = vadd.f32 %v559_v35, %v558_v33 }
  0x75   :  { %v562_v38 = vadd.f32 %v561_v36, %v560_v37 }
  0x77   :  { %563 = vst [vmem:[#allocation5 + $0x15] sm:$0x1] %v562_v38 }
  0x7e   :  { %v569_v39 = vld [vmem:[#allocation5 + $0x10] sm:$0x3f] }
  0x7f   :  { %v572_v40 = vmul.f32 0.03125, %v569_v39 }
  0x81   :  { %575 = vst [vmem:[#allocation5 + $0x10] sm:$0x3f] %v572_v40 }
  0x82   :  { %588 = dma.vmem_to_hbm [thread:$0]  %s581_s13, 384, %s583_s16, [#allocation4], %s741_s11, %s741_s11, %s742_s12  }
  0x83   :  { %738 = dma.done.wait [#allocation4], 384  }
  0x84   :  { %739 = vsyncadd [#allocation4], 4294966912 }
  0x85   :  { %593 = vsyncpa [#allocation3], 1 }
  0x86   :  { %594 = vsyncpa [#allocation4], 1 }

</bundles_post_ra>
